<compile_context>
chip_gen: v7x
topology: tpu7x:2x2x1
jax: 0.10.0
libtpu: 0.0.40
codegen_flags: <defaults>
</compile_context>

<pallas_src>
import functools

import jax
import jax.numpy as jnp
from jax.experimental import pallas as pl
from jax.experimental.pallas import tpu as pltpu


def _round_up(x, m):
    return (x + m - 1) // m * m


def _pick_tile(full, cap, align):
    """`full` is already a multiple of `align`.  Pick a tile <= cap that divides
    `full` evenly when possible (avoids padding large operands)."""
    if full <= cap:
        return full
    n0 = -(-full // cap)
    for n in range(n0, n0 + 4):
        if full % n == 0 and (full // n) % align == 0:
            return full // n
    return cap


# ----------------------------------------------------------------------------
# Generic tiled matmul kernel:   out = act(A @ B + bias)
# Accumulates directly into the (f32, k-resident) output block, no scratch.
# ----------------------------------------------------------------------------
def _mm_kernel(a_ref, b_ref, bias_ref, o_ref, *, slope):
    k = pl.program_id(2)

    @pl.when(k == 0)
    def _():
        o_ref[...] = jnp.zeros_like(o_ref)

    o_ref[...] += jnp.dot(a_ref[...], b_ref[...],
                          preferred_element_type=jnp.float32)

    @pl.when(k == pl.num_programs(2) - 1)
    def _():
        r = o_ref[...] + bias_ref[...]
        if slope is not None:
            r = jnp.where(r > 0, r, slope * r)
        o_ref[...] = r


def pallas_matmul(a, b, bias=None, bias_mode="col", slope=None,
                  compute_dtype=None):
    """act(a @ b + bias).  a:[R,K]  b:[K,C].
    bias_mode='row' -> bias:[R] (per output row), 'col' -> bias:[C]."""
    R, K = a.shape
    K2, C = b.shape
    assert K == K2
    if compute_dtype is not None:
        a = a.astype(compute_dtype)
        b = b.astype(compute_dtype)

    is_bf16 = a.dtype == jnp.bfloat16
    tm = _pick_tile(_round_up(R, 8), 512, 8)
    tn = _pick_tile(_round_up(C, 128), 4096 if is_bf16 else 2048, 128)
    tk = _pick_tile(_round_up(K, 128), 1024, 128)
    Rp, Kp, Cp = _round_up(R, tm), _round_up(K, tk), _round_up(C, tn)

    if (R, K) != (Rp, Kp):
        a = jnp.pad(a, ((0, Rp - R), (0, Kp - K)))
    if (K, C) != (Kp, Cp):
        b = jnp.pad(b, ((0, Kp - K), (0, Cp - C)))

    if bias is None:
        bias_mode = "col"
        bias_arr = jnp.zeros((1, Cp), jnp.float32)
    elif bias_mode == "row":
        bias_arr = bias.astype(jnp.float32)
        if Rp != R:
            bias_arr = jnp.pad(bias_arr, (0, Rp - R))
        bias_arr = bias_arr.reshape(Rp, 1)
    else:
        bias_arr = bias.astype(jnp.float32)
        if Cp != C:
            bias_arr = jnp.pad(bias_arr, (0, Cp - C))
        bias_arr = bias_arr.reshape(1, Cp)

    if bias_mode == "row":
        b_spec = pl.BlockSpec((tm, 1), lambda i, j, k: (i, 0))
    else:
        b_spec = pl.BlockSpec((1, tn), lambda i, j, k: (0, j))

    out = pl.pallas_call(
        functools.partial(_mm_kernel, slope=slope),
        out_shape=jax.ShapeDtypeStruct((Rp, Cp), jnp.float32),
        grid=(Rp // tm, Cp // tn, Kp // tk),
        in_specs=[
            pl.BlockSpec((tm, tk), lambda i, j, k: (i, k)),
            pl.BlockSpec((tk, tn), lambda i, j, k: (k, j)),
            b_spec,
        ],
        out_specs=pl.BlockSpec((tm, tn), lambda i, j, k: (i, j)),
        compiler_params=pltpu.CompilerParams(
            dimension_semantics=("parallel", "parallel", "arbitrary"),
            vmem_limit_bytes=48 * 1024 * 1024),
    )(a, b, bias_arr)
    if (R, C) != (Rp, Cp):
        out = out[:R, :C]
    return out


# ----------------------------------------------------------------------------
# Small whole-array elementwise / fused kernels
# ----------------------------------------------------------------------------
def _bias_act_kernel(x_ref, b_ref, o_ref, *, slope):
    r = x_ref[...] + b_ref[...]
    o_ref[...] = jnp.where(r > 0, r, slope * r)


def bias_leaky(x2d, bias, slope=0.2):
    C, M = x2d.shape
    return pl.pallas_call(
        functools.partial(_bias_act_kernel, slope=slope),
        out_shape=jax.ShapeDtypeStruct((C, M), jnp.float32),
    )(x2d.astype(jnp.float32), bias.astype(jnp.float32).reshape(C, 1))


def _l2norm_kernel(x_ref, o_ref, *, axis):
    x = x_ref[...]
    n = jnp.sqrt(jnp.sum(x * x, axis=axis, keepdims=True))
    o_ref[...] = x / jnp.maximum(n, 1e-12)


def l2_normalize(x, axis):
    return pl.pallas_call(
        functools.partial(_l2norm_kernel, axis=axis),
        out_shape=jax.ShapeDtypeStruct(x.shape, jnp.float32),
    )(x.astype(jnp.float32))


def _eucdist_kernel(x_ref, yt_ref, o_ref):
    x = x_ref[...]                                    # [m, d]
    yt = yt_ref[...]                                  # [d, n]
    xx = jnp.sum(x * x, axis=1, keepdims=True)        # [m, 1]
    yy = jnp.sum(yt * yt, axis=0, keepdims=True)      # [1, n]
    s = jnp.dot(x, yt, preferred_element_type=jnp.float32)
    d = xx + yy - 2.0 * s
    o_ref[...] = jnp.sqrt(jnp.maximum(d, 1e-12))


def euclidean_dist(x, y):
    m, n = x.shape[0], y.shape[0]
    return pl.pallas_call(
        _eucdist_kernel,
        out_shape=jax.ShapeDtypeStruct((m, n), jnp.float32),
    )(x.astype(jnp.float32), y.astype(jnp.float32).T)


def _gcn_kernel(adj_ref, h_ref, w_ref, b_ref, o_ref):
    t = jnp.dot(adj_ref[...], h_ref[...], preferred_element_type=jnp.float32)
    o_ref[...] = jnp.dot(t, w_ref[...],
                         preferred_element_type=jnp.float32) + b_ref[...]


def gcn_layer(adj, h, w, b):
    """(adj @ h) @ w + b, fused into one Pallas call (no activation)."""
    n = adj.shape[0]
    dout = w.shape[1]
    return pl.pallas_call(
        _gcn_kernel,
        out_shape=jax.ShapeDtypeStruct((n, dout), jnp.float32),
    )(adj.astype(jnp.float32), h.astype(jnp.float32),
      w.astype(jnp.float32), b.astype(jnp.float32).reshape(1, dout))


# ----------------------------------------------------------------------------
# Conv3d: im2col in [K, M] orientation (no transposes), Pallas matmul epilogue
# ----------------------------------------------------------------------------
def conv3d(x, w, b, stride, padding, slope=0.2):
    """x:[Cin,D,H,W], w:[Cout,Cin,k,k,k] (PyTorch layout)."""
    Cout, Cin, k = w.shape[0], w.shape[1], w.shape[2]
    xp = x
    if padding > 0:
        xp = jnp.pad(x, ((0, 0), (padding, padding),
                         (padding, padding), (padding, padding)))
    xp = xp.astype(jnp.bfloat16)
    D, H, W = xp.shape[1], xp.shape[2], xp.shape[3]
    Do = (D - k) // stride + 1
    Ho = (H - k) // stride + 1
    Wo = (W - k) // stride + 1

    slices = []
    for kd in range(k):
        for kh in range(k):
            for kw in range(k):
                slices.append(
                    xp[:, kd:kd + stride * (Do - 1) + 1:stride,
                          kh:kh + stride * (Ho - 1) + 1:stride,
                          kw:kw + stride * (Wo - 1) + 1:stride])
    patches = jnp.stack(slices, axis=1)               # [Cin, k^3, Do,Ho,Wo]
    patches = patches.reshape(Cin * k * k * k, Do * Ho * Wo)

    wmat = w.reshape(Cout, Cin * k * k * k).astype(jnp.bfloat16)
    out = pallas_matmul(wmat, patches, bias=b, bias_mode="row", slope=slope)
    return out.reshape(Cout, Do, Ho, Wo)


# ----------------------------------------------------------------------------
# ConvTranspose3d: col2im (cols = x^T @ W, then k^3 dilated shifted adds)
# ----------------------------------------------------------------------------
def conv_transpose3d(x, w, b, stride, padding, slope=0.2):
    """x:[Cin,D,H,W], w:[Cin,Cout,k,k,k] (PyTorch ConvTranspose3d layout)."""
    Cin, Cout, k = w.shape[0], w.shape[1], w.shape[2]
    Din, Hin, Win = x.shape[1], x.shape[2], x.shape[3]

    a = x.astype(jnp.bfloat16).reshape(Cin, -1).T           # [Min, Cin]
    wmat = w.reshape(Cin, Cout * k * k * k).astype(jnp.bfloat16)
    cols = pallas_matmul(a, wmat)                           # [Min, Cout*k^3] f32
    cols = cols.T.reshape(Cout, k, k, k, Din, Hin, Win)

    Df = (Din - 1) * stride + k
    Hf = (Hin - 1) * stride + k
    Wf = (Win - 1) * stride + k
    Do = Df - 2 * padding
    Ho = Hf - 2 * padding
    Wo = Wf - 2 * padding

    zero = jnp.array(0.0, jnp.float32)
    out_full = jnp.zeros((Cout, Df, Hf, Wf), jnp.float32)
    for kd in range(k):
        for kh in range(k):
            for kw in range(k):
                contrib = jax.lax.pad(
                    cols[:, kd, kh, kw], zero,
                    [(0, 0, 0),
                     (kd, k - 1 - kd, stride - 1),
                     (kh, k - 1 - kh, stride - 1),
                     (kw, k - 1 - kw, stride - 1)])
                out_full = out_full + contrib

    out = out_full[:, padding:padding + Do,
                      padding:padding + Ho,
                      padding:padding + Wo]
    out = bias_leaky(out.reshape(Cout, -1), b, slope)
    return out.reshape(Cout, Do, Ho, Wo)


# ----------------------------------------------------------------------------
# Parameters (deterministic synthetic init; shapes follow USLModel.__init__)
# ----------------------------------------------------------------------------
def init_params(key, base_num=48):
    keys = iter(jax.random.split(key, 64))
    p = {}

    def nrm(shape, std):
        return std * jax.random.normal(next(keys), shape, dtype=jnp.float32)

    def conv(name, cin, cout, k):
        p[name + "_w"] = nrm((cout, cin, k, k, k), (cin * k ** 3) ** -0.5)
        p[name + "_b"] = nrm((cout,), 0.01)

    def deconv(name, cin, cout, k):
        p[name + "_w"] = nrm((cin, cout, k, k, k), (cin * k ** 3) ** -0.5)
        p[name + "_b"] = nrm((cout,), 0.01)

    def dense(name, din, dout):
        p[name + "_w"] = nrm((din, dout), din ** -0.5)
        p[name + "_b"] = nrm((dout,), 0.01)

    conv("conv1", 1, 32, 4);   conv("conv2", 32, 64, 4)
    conv("conv3", 64, 128, 4); conv("conv4", 128, 256, 3)
    conv("conv5", 256, 512, 2)
    deconv("deconv5", 512, 256, 4); conv("conv5_1", 256, 256, 4)
    deconv("deconv4", 512, 128, 4); conv("conv4_1", 128, 128, 4)
    deconv("deconv3", 256, 64, 4);  conv("conv3_1", 64, 64, 3)
    deconv("deconv2", 128, 32, 4);  conv("conv2_1", 32, 32, 3)
    deconv("deconv1", 64, 4, 5);    conv("conv1_1", 4, 4, 4)
    dense("dense1", 484, 600); dense("dense2", 600, 600)
    b3 = base_num // 3
    tmp = base_num - 2 * b3
    dense("gcn_1_1", 484, 256); dense("gcn_1_2", 256, 128); dense("gcn_1_3", 128, b3)
    dense("gcn_2_1", 484, 128); dense("gcn_2_2", 128, b3)
    dense("gcn_3_1", 484, tmp)
    dense("db1", 48 * 48, 48 * 48)
    dense("db2", 48 * 48, 48 * 48)
    dense("db3", 48 * 48, 48 * 48)
    p["latent_fea"] = nrm((48, 600), 600 ** -0.5)
    # TODO(synk): self.tao is a learnable scalar never used in forward(); omitted.
    return p


# ----------------------------------------------------------------------------
# Model forward
# ----------------------------------------------------------------------------
def spectral_elements(p, x, centroid, adj):
    c = lambda n, h, s, pd: conv3d(h, p[n + "_w"], p[n + "_b"], s, pd)
    d = lambda n, h, s, pd: conv_transpose3d(h, p[n + "_w"], p[n + "_b"], s, pd)

    h1 = c("conv1", x, 2, 1)
    h2 = c("conv2", h1, 2, 1)
    h3 = c("conv3", h2, 2, 1)
    h4 = c("conv4", h3, 2, 1)
    h5 = c("conv5", h4, 2, 0)

    hd5 = d("deconv5", h5, 2, 1)
    hd5 = jnp.pad(hd5, ((0, 0), (1, 2), (1, 2), (1, 2)))
    h5_1 = c("conv5_1", hd5, 1, 0)
    hd4 = d("deconv4", jnp.concatenate([h5_1, h4], axis=0), 2, 1)
    hd4 = jnp.pad(hd4, ((0, 0), (1, 2), (1, 2), (1, 2)))
    h4_1 = c("conv4_1", hd4, 1, 0)
    hd3 = d("deconv3", jnp.concatenate([h4_1, h3], axis=0), 2, 0)
    h3_1 = c("conv3_1", hd3, 1, 0)
    hd2 = d("deconv2", jnp.concatenate([h3_1, h2], axis=0), 2, 0)
    h2_1 = c("conv2_1", hd2, 1, 0)
    hd1 = d("deconv1", jnp.concatenate([h2_1, h1], axis=0), 2, 1)
    h1_1 = c("conv1_1", hd1, 1, 1)

    def gather_middle(fmap, idx):
        return fmap[:, idx[:, 0], idx[:, 1], idx[:, 2]].T    # [N, C]

    cen = centroid.astype(jnp.int32)
    f0 = gather_middle(h2_1, cen // 2)
    f0 = jnp.concatenate([gather_middle(h3_1, cen // 4), f0], axis=1)
    f0 = jnp.concatenate([gather_middle(h4_1, cen // 8), f0], axis=1)
    f0 = jnp.concatenate([gather_middle(h5_1, cen // 16), f0], axis=1)
    f0 = jnp.concatenate([gather_middle(h1_1, cen), f0], axis=1)   # [N, 484]
    f0_l2 = l2_normalize(f0, axis=0)

    fc1 = pallas_matmul(f0, p["dense1_w"], p["dense1_b"],
                        bias_mode="col", slope=0.2)
    re_fea = pallas_matmul(fc1, p["dense2_w"], p["dense2_b"],
                           bias_mode="col", slope=0.2)

    def gcn(h, name):
        return gcn_layer(adj, h, p[name + "_w"], p[name + "_b"])

    g11 = gcn(f0_l2, "gcn_1_1")
    g12 = gcn(g11, "gcn_1_2")
    g13 = gcn(g12, "gcn_1_3")
    g21 = gcn(f0_l2, "gcn_2_1")
    g22 = gcn(g21, "gcn_2_2")
    g31 = gcn(f0_l2, "gcn_3_1")
    re_base = l2_normalize(jnp.concatenate([g31, g22, g13], axis=1), axis=0)
    return re_fea, re_base, h1_1[3]


def cal_C_deep(p, fea_spec, latent):
    sim = pallas_matmul(fea_spec, latent.T)                  # [48, 48]
    scale = jnp.linalg.norm(fea_spec) * jnp.linalg.norm(latent) + 1e-6
    sim = sim / scale                                        # tiny scalar glue
    v = sim.reshape(1, 48 * 48)
    v = pallas_matmul(v, p["db1_w"], p["db1_b"], bias_mode="col")
    v = pallas_matmul(v, p["db2_w"], p["db2_b"], bias_mode="col")
    v = pallas_matmul(v, p["db3_w"], p["db3_b"], bias_mode="col")
    return v.reshape(48, 48)


def cal_P(C, base1, base2):
    cb1 = pallas_matmul(base1, C.T)                          # == (C @ base1.T).T
    P_21 = euclidean_dist(base2, cb1)
    P_21 = l2_normalize(P_21, axis=0)
    P_21 = l2_normalize(P_21, axis=1)
    return P_21


def usl_forward(p, input_1, input_2):
    v1 = input_1["volume"][0]                 # [1, D, H, W]
    c1 = input_1["centroid"][0].astype(jnp.int32)
    a1 = input_1["adj"][0].astype(jnp.float32)
    v2 = input_2["volume"][0]
    c2 = input_2["centroid"][0].astype(jnp.int32)
    a2 = input_2["adj"][0].astype(jnp.float32)

    feature_1, rebase_1, _revol_1 = spectral_elements(p, v1, c1, a1)
    feature_2, rebase_2, _revol_2 = spectral_elements(p, v2, c2, a2)

    fea_spec_1 = pallas_matmul(rebase_1.T, feature_1)        # [48, 600]
    fea_spec_2 = pallas_matmul(rebase_2.T, feature_2)

    c_1 = cal_C_deep(p, fea_spec_1, p["latent_fea"])
    c_2 = cal_C_deep(p, fea_spec_2, p["latent_fea"])
    C_12 = pallas_matmul(c_1, c_2.T)
    C_21 = C_12.T
    P = cal_P(C_21, rebase_1, rebase_2)
    return (C_21, c_1, c_2, P, rebase_1, rebase_2,
            feature_1, feature_2, p["latent_fea"])


# ----------------------------------------------------------------------------
if __name__ == "__main__":
    key = jax.random.PRNGKey(0)
    pkey, k1, k2, k3, k4, k5, k6 = jax.random.split(key, 7)
    params = init_params(pkey)

    D = 32   # smallest spatial size compatible with the 5-level encoder/decoder
    N = 8    # number of centroids / GCN nodes

    def make_input(kv, kc, ka):
        return {
            "volume": jax.random.normal(kv, (1, 1, D, D, D), dtype=jnp.float32),
            "centroid": jax.random.randint(kc, (1, N, 3), 0, D),
            "adj": jax.random.uniform(ka, (1, N, N), dtype=jnp.float32),
        }

    input_1 = make_input(k1, k2, k3)
    input_2 = make_input(k4, k5, k6)

    outs = usl_forward(params, input_1, input_2)
    outs = jax.block_until_ready(outs)

    C_21, c_1, c_2, P, rebase_1, rebase_2, feature_1, feature_2, latent = outs
    assert C_21.shape == (48, 48) and c_1.shape == (48, 48) and c_2.shape == (48, 48)
    assert P.shape == (N, N)
    assert rebase_1.shape == (N, 48) and feature_1.shape == (N, 600)
    assert latent.shape == (48, 600)
    assert all(bool(jnp.all(jnp.isfinite(o))) for o in outs)
    print("KERNEL_OK")
</pallas_src>

<mosaic_0001>
module attributes {stable_mosaic.version = 11 : i64} {
  func.func @_mm_kernel(%arg0: i32, %arg1: i32, %arg2: i32, %arg3: memref<32x128xbf16, #tpu.memory_space<vmem>>, %arg4: memref<128x4096xbf16, #tpu.memory_space<vmem>>, %arg5: memref<32x1xf32, #tpu.memory_space<vmem>>, %arg6: memref<32x4096xf32, #tpu.memory_space<vmem>>) attributes {dimension_semantics = [#tpu.dimension_semantics<parallel>, #tpu.dimension_semantics<parallel>, #tpu.dimension_semantics<arbitrary>], iteration_bounds = array<i64: 1, 1, 1>, scalar_prefetch = 0 : i64, scratch_operands = 0 : i64, tpu.core_type = #tpu.core_type<tc>, window_params = [{transform_indices = @transform_0, window_bounds = array<i64: 32, 128>}, {transform_indices = @transform_1, window_bounds = array<i64: 128, 4096>}, {transform_indices = @transform_2, window_bounds = array<i64: 32, 1>}, {transform_indices = @transform_3, window_bounds = array<i64: 32, 4096>}]} {
    %c0_i32 = arith.constant 0 : i32
    %0 = arith.cmpi eq, %arg2, %c0_i32 : i32
    %1 = arith.extui %0 : i1 to i32
    %c0_i32_0 = arith.constant 0 : i32
    %2 = arith.cmpi ne, %1, %c0_i32_0 : i32
    scf.if %2 {
      %cst_10 = arith.constant 0.000000e+00 : f32
      %12 = vector.broadcast %cst_10 : f32 to vector<32x4096xf32>
      %c0_11 = arith.constant 0 : index
      %c0_12 = arith.constant 0 : index
      %13 = vector.load %arg6[%c0_11, %c0_12] : memref<32x4096xf32, #tpu.memory_space<vmem>>, vector<32x4096xf32>
      tpu.vector_store %arg6[%c0_11, %c0_12], %12 {strides = array<i32>} : memref<32x4096xf32, #tpu.memory_space<vmem>>, vector<32x4096xf32>,
    } else {
    }
    %c0 = arith.constant 0 : index
    %c0_1 = arith.constant 0 : index
    %3 = vector.load %arg6[%c0, %c0_1] : memref<32x4096xf32, #tpu.memory_space<vmem>>, vector<32x4096xf32>
    %c0_2 = arith.constant 0 : index
    %c0_3 = arith.constant 0 : index
    %4 = vector.load %arg3[%c0_2, %c0_3] : memref<32x128xbf16, #tpu.memory_space<vmem>>, vector<32x128xbf16>
    %c0_4 = arith.constant 0 : index
    %c0_5 = arith.constant 0 : index
    %5 = vector.load %arg4[%c0_4, %c0_5] : memref<128x4096xbf16, #tpu.memory_space<vmem>>, vector<128x4096xbf16>
    %cst = arith.constant dense<0.000000e+00> : vector<32x4096xf32>
    %6 = tpu.matmul %4, %5, %cst {dimension_numbers = #tpu.dot_dimension_numbers<[1], [0], [0], [1], [0, 0, 1, 1], [], []>} : vector<32x128xbf16>, vector<128x4096xbf16>, vector<32x4096xf32> -> vector<32x4096xf32>
    %7 = arith.addf %3, %6 : vector<32x4096xf32>
    %c0_6 = arith.constant 0 : index
    %c0_7 = arith.constant 0 : index
    %8 = vector.load %arg6[%c0_6, %c0_7] : memref<32x4096xf32, #tpu.memory_space<vmem>>, vector<32x4096xf32>
    tpu.vector_store %arg6[%c0_6, %c0_7], %7 {strides = array<i32>} : memref<32x4096xf32, #tpu.memory_space<vmem>>, vector<32x4096xf32>,
    %c0_i32_8 = arith.constant 0 : i32
    %9 = arith.cmpi eq, %arg2, %c0_i32_8 : i32
    %10 = arith.extui %9 : i1 to i32
    %c0_i32_9 = arith.constant 0 : i32
    %11 = arith.cmpi ne, %10, %c0_i32_9 : i32
    scf.if %11 {
      %c0_10 = arith.constant 0 : index
      %c0_11 = arith.constant 0 : index
      %12 = vector.load %arg6[%c0_10, %c0_11] : memref<32x4096xf32, #tpu.memory_space<vmem>>, vector<32x4096xf32>
      %c0_12 = arith.constant 0 : index
      %c0_13 = arith.constant 0 : index
      %13 = vector.load %arg5[%c0_12, %c0_13] : memref<32x1xf32, #tpu.memory_space<vmem>>, vector<32x1xf32>
      %14 = vector.broadcast %13 : vector<32x1xf32> to vector<32x4096xf32>
      %15 = arith.addf %12, %14 : vector<32x4096xf32>
      %cst_14 = arith.constant 0.000000e+00 : f32
      %16 = vector.broadcast %cst_14 : f32 to vector<32x4096xf32>
      %17 = arith.cmpf ogt, %15, %16 : vector<32x4096xf32>
      %cst_15 = arith.constant 2.000000e-01 : f32
      %18 = vector.broadcast %cst_15 : f32 to vector<32x4096xf32>
      %19 = arith.mulf %18, %15 : vector<32x4096xf32>
      %20 = arith.select %17, %15, %19 : vector<32x4096xi1>, vector<32x4096xf32>
      %c0_16 = arith.constant 0 : index
      %c0_17 = arith.constant 0 : index
      %21 = vector.load %arg6[%c0_16, %c0_17] : memref<32x4096xf32, #tpu.memory_space<vmem>>, vector<32x4096xf32>
      tpu.vector_store %arg6[%c0_16, %c0_17], %20 {strides = array<i32>} : memref<32x4096xf32, #tpu.memory_space<vmem>>, vector<32x4096xf32>,
    } else {
    }
    return
  }
  func.func @transform_0(%arg0: i32, %arg1: i32, %arg2: i32) -> (i32, i32) {
    %c0_i32 = arith.constant 0 : i32
    return %arg0, %arg2 : i32, i32
  }
  func.func @transform_1(%arg0: i32, %arg1: i32, %arg2: i32) -> (i32, i32) {
    %c0_i32 = arith.constant 0 : i32
    return %arg2, %arg1 : i32, i32
  }
  func.func @transform_2(%arg0: i32, %arg1: i32, %arg2: i32) -> (i32, i32) {
    %c0_i32 = arith.constant 0 : i32
    %c0_i32_0 = arith.constant 0 : i32
    return %arg0, %c0_i32 : i32, i32
  }
  func.func @transform_3(%arg0: i32, %arg1: i32, %arg2: i32) -> (i32, i32) {
    %c0_i32 = arith.constant 0 : i32
    return %arg0, %arg1 : i32, i32
  }
}

</mosaic_0001>

<bundles_post_ra>
// kernel: tpu_custom_call.1
= control target key start
LH: loop header
LB: loop body
LE: loop exit
PB: predicated region body
PF: predicated region fallthrough
CT: control target
= control target key end

     0   :  { %8 = vsyncpa [#allocation3], 0  ;;  %s4371_s0 = inlined_call_operand.vmem [shape: bf16[32,128], index: 0, kind: input, shape index: {}]   ;;  %s4372_s1 = inlined_call_operand.hbm [shape: bf16[128,4096], index: 1, kind: input, shape index: {}]   ;;  %s4373_s2 = inlined_call_operand.vmem [shape: f32[32,1], index: 2, kind: input, shape index: {}]   ;;  %s4374_s3 = inlined_call_operand.hbm [shape: f32[32,4096], index: 3, kind: output, shape index: {}]  }
   0x1   :  { %9 = vsyncpa [#allocation4], 0  ;;  %s4078_s12 = smov [#allocation2]   ;;  %s4030_s16 = scalar_lea.hbm %s4372_s1, 32768 }
   0x2   :  { %s17_s13 = sshll.u32 %s4078_s12, 4  ;;  %p4031_p0 = scmp.ne.s32.totalorder %s4372_s1, %s4030_s16  ;;  %s18_s13 = int_to_ptr.vmem [resolvable:$true] %s17_s13 }
   0x3   :  { %p4034_p1 = scmp.lt.u32.totalorder %s4030_s16, %s4372_s1 }
   0x5   :  { %p4036_p2 = pnand %p4034_p1, %p4031_p0 }
   0x7   :  { %4039 = shalt.err (!%p4036_p2)
}
   0x8   :  { %s4040_s21 = scalar_lea.vmem %s18_s13, 32768  ;;  %p4045_p4 = scmp.lt.s32.totalorder %s18_s13, %s18_s13 }
   0x9   :  { %p4041_p3 = scmp.ne.s32.totalorder %s18_s13, %s4040_s21  ;;  %p4046_p5 = scmp.lt.s32.totalorder %s4040_s21, %s4040_s21 }
   0xb   :  { %p4047_p6 = por %p4046_p5, %p4045_p4 }
   0xd   :  { %p4048_p7 = pnand %p4047_p6, %p4041_p3 }
   0xf   :  { %4051 = shalt.err (!%p4048_p7)
}
  0x10   :  { %s4079_s22 = smov 2048   ;;  %s4080_s23 = smov 128  }
  0x11   :  { %23 = dma.hbm_to_vmem [thread:$0]  %s4372_s1, 32768, %s18_s13, [#allocation3], %s4079_s22, %s4079_s22, %s4080_s23  }
  0x12   :  { %4074 = dma.done.wait [#allocation3], 32768  }
  0x13   :  { %4075 = vsyncadd [#allocation3], 4294934528  ;;  %v4081_v0 = vmov 0   ;;  %v294_v1 = vld [vmem:[#allocation2] sm:$0xff]  ;;  %v295_v3 = vld [vmem:[#allocation2 + $0x8] sm:$0xff] }
  0x14   :  { %1874 = vmatprep.mubr.bf16.mxu0 %v4081_v0  ;;  %1927 = vmatprep.mubr.bf16.mxu1 %v4081_v0  ;;  %v310_v2 = vld [vmem:[#allocation2 + $0x80] sm:$0xff]  ;;  %v311_v5 = vld [vmem:[#allocation2 + $0x88] sm:$0xff]  ;;  %v296_v63 = vld [vmem:[#allocation2 + $0x10] sm:$0xff] }
  0x15   :  { %4024 = vset.pattern.permute.xlu0 %v4081_v0  ;;  %4025 = vset.pattern.permute.xlu1 %v4081_v0  ;;  %v3761_v4 = vcombine.high %v294_v1, %v310_v2  ;;  %v3760_v6 = vcombine.low %v294_v1, %v310_v2  ;;  %v326_v7 = vld [vmem:[#allocation2 + $0x100] sm:$0xff]  ;;  %v3763_v9 = vcombine.high %v295_v3, %v311_v5  ;;  %v327_v12 = vld [vmem:[#allocation2 + $0x108] sm:$0xff]  ;;  %v312_v1 = vld [vmem:[#allocation2 + $0x90] sm:$0xff] }
  0x16   :  { %v342_v8 = vld [vmem:[#allocation2 + $0x180] sm:$0xff]  ;;  %v3762_v10 = vcombine.low %v295_v3, %v311_v5  ;;  %v343_v13 = vld [vmem:[#allocation2 + $0x188] sm:$0xff]  ;;  %v297_v2 = vld [vmem:[#allocation2 + $0x18] sm:$0xff] }
  0x17   :  { %v3793_v11 = vcombine.high %v326_v7, %v342_v8  ;;  %v358_v14 = vld [vmem:[#allocation2 + $0x200] sm:$0xff]  ;;  %1842 = vmatprep.subr.bf16.mxu0 %v3761_v4  ;;  %v3795_v15 = vcombine.high %v327_v12, %v343_v13  ;;  %v359_v17 = vld [vmem:[#allocation2 + $0x208] sm:$0xff]  ;;  %1895 = vmatprep.subr.bf16.mxu1 %v3763_v9  ;;  %v3792_v19 = vcombine.low %v326_v7, %v342_v8  ;;  %v313_v3 = vld [vmem:[#allocation2 + $0x98] sm:$0xff] }
  0x18   :  { %v374_v16 = vld [vmem:[#allocation2 + $0x280] sm:$0xff]  ;;  %v375_v18 = vld [vmem:[#allocation2 + $0x288] sm:$0xff]  ;;  %1843 = vmatpush1.bf16.msra.mxu0 %v3760_v6  ;;  %1896 = vmatpush1.bf16.msra.mxu1 %v3762_v10  ;;  %v3794_v20 = vcombine.low %v327_v12, %v343_v13  ;;  %v3765_v6 = vcombine.high %v296_v63, %v312_v1  ;;  %v3767_v7 = vcombine.high %v297_v2, %v313_v3  ;;  %v328_v8 = vld [vmem:[#allocation2 + $0x110] sm:$0xff] }
  0x19   :  { %1844 = vmatprep.subr.bf16.mxu0 %v3793_v11  ;;  %v3825_v21 = vcombine.high %v358_v14, %v374_v16  ;;  %1897 = vmatprep.subr.bf16.mxu1 %v3795_v15  ;;  %v3827_v22 = vcombine.high %v359_v17, %v375_v18  ;;  %v390_v23 = vld [vmem:[#allocation2 + $0x300] sm:$0xff]  ;;  %v391_v25 = vld [vmem:[#allocation2 + $0x308] sm:$0xff]  ;;  %v3824_v27 = vcombine.low %v358_v14, %v374_v16  ;;  %v344_v9 = vld [vmem:[#allocation2 + $0x190] sm:$0xff] }
  0x1a   :  { %v406_v24 = vld [vmem:[#allocation2 + $0x380] sm:$0xff]  ;;  %v407_v26 = vld [vmem:[#allocation2 + $0x388] sm:$0xff]  ;;  %v3826_v28 = vcombine.low %v359_v17, %v375_v18  ;;  %v329_v11 = vld [vmem:[#allocation2 + $0x118] sm:$0xff]  ;;  %v3764_v13 = vcombine.low %v296_v63, %v312_v1  ;;  %v3766_v14 = vcombine.low %v297_v2, %v313_v3  ;;  %v3797_v15 = vcombine.high %v328_v8, %v344_v9 }
  0x1b   :  { %v3857_v29 = vcombine.high %v390_v23, %v406_v24  ;;  %v3859_v30 = vcombine.high %v391_v25, %v407_v26  ;;  %v422_v31 = vld [vmem:[#allocation2 + $0x400] sm:$0xff]  ;;  %v423_v33 = vld [vmem:[#allocation2 + $0x408] sm:$0xff]  ;;  %v3856_v35 = vcombine.low %v390_v23, %v406_v24  ;;  %v3858_v36 = vcombine.low %v391_v25, %v407_v26  ;;  %v345_v12 = vld [vmem:[#allocation2 + $0x198] sm:$0xff] }
  0x1c   :  { %1845 = vmatpush1.bf16.msra.mxu0 %v3792_v19  ;;  %1898 = vmatpush1.bf16.msra.mxu1 %v3794_v20  ;;  %v438_v32 = vld [vmem:[#allocation2 + $0x480] sm:$0xff]  ;;  %v439_v34 = vld [vmem:[#allocation2 + $0x488] sm:$0xff]  ;;  %v3799_v16 = vcombine.high %v329_v11, %v345_v12  ;;  %v360_v17 = vld [vmem:[#allocation2 + $0x210] sm:$0xff] }
  0x1d   :  { %1846 = vmatprep.subr.bf16.mxu0 %v3825_v21  ;;  %1899 = vmatprep.subr.bf16.mxu1 %v3827_v22  ;;  %v3889_v37 = vcombine.high %v422_v31, %v438_v32  ;;  %v3891_v38 = vcombine.high %v423_v33, %v439_v34  ;;  %v454_v39 = vld [vmem:[#allocation2 + $0x500] sm:$0xff]  ;;  %v455_v41 = vld [vmem:[#allocation2 + $0x508] sm:$0xff]  ;;  %v3888_v43 = vcombine.low %v422_v31, %v438_v32  ;;  %v376_v18 = vld [vmem:[#allocation2 + $0x290] sm:$0xff] }
  0x1e   :  { %v470_v40 = vld [vmem:[#allocation2 + $0x580] sm:$0xff]  ;;  %v471_v42 = vld [vmem:[#allocation2 + $0x588] sm:$0xff]  ;;  %v3890_v44 = vcombine.low %v423_v33, %v439_v34  ;;  %v361_v19 = vld [vmem:[#allocation2 + $0x218] sm:$0xff]  ;;  %v3796_v21 = vcombine.low %v328_v8, %v344_v9  ;;  %v3798_v22 = vcombine.low %v329_v11, %v345_v12  ;;  %v3829_v23 = vcombine.high %v360_v17, %v376_v18 }
  0x1f   :  { %v3921_v45 = vcombine.high %v454_v39, %v470_v40  ;;  %v486_v46 = vld [vmem:[#allocation2 + $0x600] sm:$0xff]  ;;  %v3923_v47 = vcombine.high %v455_v41, %v471_v42  ;;  %v487_v49 = vld [vmem:[#allocation2 + $0x608] sm:$0xff]  ;;  %v3920_v51 = vcombine.low %v454_v39, %v470_v40  ;;  %v3922_v52 = vcombine.low %v455_v41, %v471_v42  ;;  %v377_v20 = vld [vmem:[#allocation2 + $0x298] sm:$0xff] }
  0x20   :  { %1847 = vmatpush1.bf16.msra.mxu0 %v3824_v27  ;;  %1900 = vmatpush1.bf16.msra.mxu1 %v3826_v28  ;;  %v502_v48 = vld [vmem:[#allocation2 + $0x680] sm:$0xff]  ;;  %v503_v50 = vld [vmem:[#allocation2 + $0x688] sm:$0xff]  ;;  %v3831_v24 = vcombine.high %v361_v19, %v377_v20  ;;  %v392_v25 = vld [vmem:[#allocation2 + $0x310] sm:$0xff]  ;;  %v3830_v31 = vcombine.low %v361_v19, %v377_v20 }
  0x21   :  { %1848 = vmatprep.subr.bf16.mxu0 %v3857_v29  ;;  %1901 = vmatprep.subr.bf16.mxu1 %v3859_v30  ;;  %v3953_v53 = vcombine.high %v486_v46, %v502_v48  ;;  %v3955_v54 = vcombine.high %v487_v49, %v503_v50  ;;  %v518_v55 = vld [vmem:[#allocation2 + $0x700] sm:$0xff]  ;;  %v519_v57 = vld [vmem:[#allocation2 + $0x708] sm:$0xff]  ;;  %v3952_v59 = vcombine.low %v486_v46, %v502_v48  ;;  %v408_v26 = vld [vmem:[#allocation2 + $0x390] sm:$0xff] }
  0x22   :  { %v534_v56 = vld [vmem:[#allocation2 + $0x780] sm:$0xff]  ;;  %v535_v58 = vld [vmem:[#allocation2 + $0x788] sm:$0xff]  ;;  %v3954_v60 = vcombine.low %v487_v49, %v503_v50  ;;  %v393_v27 = vld [vmem:[#allocation2 + $0x318] sm:$0xff]  ;;  %v3828_v30 = vcombine.low %v360_v17, %v376_v18  ;;  %v3861_v32 = vcombine.high %v392_v25, %v408_v26 }
  0x23   :  { %v3985_v61 = vcombine.high %v518_v55, %v534_v56  ;;  %v3987_v62 = vcombine.high %v519_v57, %v535_v58  ;;  %v3984_v4 = vcombine.low %v518_v55, %v534_v56  ;;  %v3986_v5 = vcombine.low %v519_v57, %v535_v58  ;;  %v4124_v10 = vld [vmem:[%s4371_s0] sm:$0xff]   ;;  %v409_v28 = vld [vmem:[#allocation2 + $0x398] sm:$0xff]  ;;  %v4133_v29 = vld [vmem:[%s4371_s0 + $0x8] sm:$0xff]  }
  0x24   :  { %1849 = vmatpush1.bf16.msra.mxu0 %v3856_v35  ;;  %1902 = vmatpush1.bf16.msra.mxu1 %v3858_v36  ;;  %v3863_v33 = vcombine.high %v393_v27, %v409_v28  ;;  %v424_v34 = vld [vmem:[#allocation2 + $0x410] sm:$0xff]  ;;  %v425_v36 = vld [vmem:[#allocation2 + $0x418] sm:$0xff]  ;;  %v3077_v39 = vld [vmem:[%s4373_s2] sm:$0xff]  ;;  %v3862_v40 = vcombine.low %v393_v27, %v409_v28 }
  0x25   :  { %1850 = vmatprep.subr.bf16.mxu0 %v3889_v37  ;;  %1903 = vmatprep.subr.bf16.mxu1 %v3891_v38  ;;  %v440_v35 = vld [vmem:[#allocation2 + $0x490] sm:$0xff]  ;;  %v441_v37 = vld [vmem:[#allocation2 + $0x498] sm:$0xff]  ;;  %v3860_v38 = vcombine.low %v392_v25, %v408_v26  ;;  %v3078_v48 = vld [vmem:[%s4373_s2 + $0x8] sm:$0xff] }
  0x26   :  { %v3893_v41 = vcombine.high %v424_v34, %v440_v35  ;;  %v3895_v42 = vcombine.high %v425_v36, %v441_v37  ;;  %v473_v46 = vld [vmem:[#allocation2 + $0x598] sm:$0xff]  ;;  %3083 = vperm.xlu0 %4024, %v3077_v39   ;;  %v3894_v49 = vcombine.low %v425_v36, %v441_v37  ;;  %v3079_v57 = vld [vmem:[%s4373_s2 + $0x10] sm:$0xff]  ;;  %v314_v8 = vld [vmem:[#allocation2 + $0xa0] sm:$0xff] }
  0x27   :  { %v505_v55 = vld [vmem:[#allocation2 + $0x698] sm:$0xff]  ;;  %3093 = vperm.xlu1 %4025, %v3079_v57   ;;  %v299_v9 = vld [vmem:[#allocation2 + $0x28] sm:$0xff]  ;;  %v346_v17 = vld [vmem:[#allocation2 + $0x1a0] sm:$0xff] }
  0x28   :  { %1851 = vmatpush1.bf16.msra.mxu0 %v3888_v43  ;;  %1904 = vmatpush1.bf16.msra.mxu1 %v3890_v44  ;;  %v456_v43 = vld [vmem:[#allocation2 + $0x510] sm:$0xff]  ;;  %v521_v63 = vld [vmem:[#allocation2 + $0x718] sm:$0xff]  ;;  %v315_v11 = vld [vmem:[#allocation2 + $0xa8] sm:$0xff] }
  0x29   :  { %1852 = vmatprep.subr.bf16.mxu0 %v3921_v45  ;;  %1905 = vmatprep.subr.bf16.mxu1 %v3923_v47  ;;  %v472_v44 = vld [vmem:[#allocation2 + $0x590] sm:$0xff]  ;;  %v457_v45 = vld [vmem:[#allocation2 + $0x518] sm:$0xff]  ;;  %v3892_v47 = vcombine.low %v424_v34, %v440_v35  ;;  %v331_v18 = vld [vmem:[#allocation2 + $0x128] sm:$0xff] }
  0x2a   :  { %v3925_v50 = vcombine.high %v456_v43, %v472_v44  ;;  %3088 = vperm.xlu0 %4024, %v3078_v48   ;;  %v3924_v56 = vcombine.low %v456_v43, %v472_v44  ;;  %v3926_v58 = vcombine.low %v457_v45, %v473_v46  ;;  %v537_v1 = vld [vmem:[#allocation2 + $0x798] sm:$0xff]  ;;  %v347_v19 = vld [vmem:[#allocation2 + $0x1a8] sm:$0xff]  ;;  %v378_v25 = vld [vmem:[#allocation2 + $0x2a0] sm:$0xff] }
  0x2b   :  { %v3080_v2 = vld [vmem:[%s4373_s2 + $0x18] sm:$0xff]  ;;  %v363_v26 = vld [vmem:[#allocation2 + $0x228] sm:$0xff]  ;;  %v410_v34 = vld [vmem:[#allocation2 + $0x3a0] sm:$0xff] }
  0x2c   :  { %1853 = vmatpush1.bf16.msra.mxu0 %v3920_v51  ;;  %1906 = vmatpush1.bf16.msra.mxu1 %v3922_v52  ;;  %v3927_v51 = vcombine.high %v457_v45, %v473_v46  ;;  %v488_v52 = vld [vmem:[#allocation2 + $0x610] sm:$0xff]  ;;  %v379_v27 = vld [vmem:[#allocation2 + $0x2a8] sm:$0xff]  ;;  %v490_v57 = vld [vmem:[#allocation2 + $0x620] sm:$0xff] }
  0x2d   :  { %1854 = vmatprep.subr.bf16.mxu0 %v3953_v53  ;;  %1907 = vmatprep.subr.bf16.mxu1 %v3955_v54  ;;  %v504_v53 = vld [vmem:[#allocation2 + $0x690] sm:$0xff]  ;;  %v489_v54 = vld [vmem:[#allocation2 + $0x618] sm:$0xff]  ;;  %v395_v35 = vld [vmem:[#allocation2 + $0x328] sm:$0xff] }
  0x2e   :  { %v3956_v3 = vcombine.low %v488_v52, %v504_v53  ;;  %3098 = vperm.xlu1 %4025, %v3080_v2   ;;  %v411_v36 = vld [vmem:[#allocation2 + $0x3a8] sm:$0xff]  ;;  %v522_v2 = vld [vmem:[#allocation2 + $0x720] sm:$0xff] }
  0x2f   :  { %v427_v43 = vld [vmem:[#allocation2 + $0x428] sm:$0xff]  ;;  %v3866_v46 = vcombine.low %v395_v35, %v411_v36 }
  0x30   :  { %1855 = vmatpush1.bf16.msra.mxu0 %v3952_v59  ;;  %1908 = vmatpush1.bf16.msra.mxu1 %v3954_v60  ;;  %v3957_v59 = vcombine.high %v488_v52, %v504_v53  ;;  %v3959_v60 = vcombine.high %v489_v54, %v505_v55  ;;  %v443_v44 = vld [vmem:[#allocation2 + $0x4a8] sm:$0xff] }
  0x31   :  { %1856 = vmatprep.subr.bf16.mxu0 %v3985_v61  ;;  %1909 = vmatprep.subr.bf16.mxu1 %v3987_v62  ;;  %v520_v61 = vld [vmem:[#allocation2 + $0x710] sm:$0xff]  ;;  %v3899_v48 = vcombine.high %v427_v43, %v443_v44  ;;  %v475_v52 = vld [vmem:[#allocation2 + $0x5a8] sm:$0xff] }
  0x32   :  { %v536_v62 = vld [vmem:[#allocation2 + $0x790] sm:$0xff] }
  0x33   :  { %v3988_v12 = vcombine.low %v520_v61, %v536_v62 }
  0x34   :  { %1857 = vmatpush1.bf16.msra.mxu0 %v3984_v4  ;;  %1910 = vmatpush1.bf16.msra.mxu1 %v3986_v5  ;;  %v3958_v4 = vcombine.low %v489_v54, %v505_v55  ;;  %v3989_v5 = vcombine.high %v520_v61, %v536_v62  ;;  %v3898_v54 = vcombine.low %v427_v43, %v443_v44  ;;  %v428_v44 = vld [vmem:[#allocation2 + $0x430] sm:$0xff] }
  0x35   :  { %1948 = vmatprep.subr.bf16.mxu0 %v3765_v6  ;;  %2001 = vmatprep.subr.bf16.mxu1 %v3767_v7  ;;  %v3991_v6 = vcombine.high %v521_v63, %v537_v1  ;;  %v298_v7 = vld [vmem:[#allocation2 + $0x20] sm:$0xff] }
  0x36   :  { %v3768_v20 = vcombine.low %v298_v7, %v314_v8 }
  0x37   :  { %1875 = vmatmul.mubr.bf16.vlgmr.msra.gmra.mrb[0].mxu0 %v4124_v10  ;;  %1928 = vmatmul.mubr.bf16.vlgmr.msra.gmra.mrb[0].mxu1 %v4124_v10 }
  0x38   :  { %1949 = vmatpush1.bf16.msra.mxu0 %v3764_v13  ;;  %2002 = vmatpush1.bf16.msra.mxu1 %v3766_v14  ;;  %v3990_v13 = vcombine.low %v521_v63, %v537_v1  ;;  %v3769_v14 = vcombine.high %v298_v7, %v314_v8 }
  0x39   :  { %1950 = vmatprep.subr.bf16.mxu0 %v3797_v15  ;;  %2003 = vmatprep.subr.bf16.mxu1 %v3799_v16  ;;  %v3771_v15 = vcombine.high %v299_v9, %v315_v11  ;;  %v330_v16 = vld [vmem:[#allocation2 + $0x120] sm:$0xff] }
  0x3a   :  { %1884 = vmatprep.mubr.bf16.mxu0 %v4081_v0  ;;  %1937 = vmatprep.mubr.bf16.mxu1 %v4081_v0  ;;  %v3800_v28 = vcombine.low %v330_v16, %v346_v17 }
  0x3c   :  { %1951 = vmatpush1.bf16.msra.mxu0 %v3796_v21  ;;  %2004 = vmatpush1.bf16.msra.mxu1 %v3798_v22  ;;  %v3770_v21 = vcombine.low %v299_v9, %v315_v11  ;;  %v3801_v22 = vcombine.high %v330_v16, %v346_v17  ;;  %v300_v11 = vld [vmem:[#allocation2 + $0x30] sm:$0xff] }
  0x3d   :  { %1952 = vmatprep.subr.bf16.mxu0 %v3829_v23  ;;  %2005 = vmatprep.subr.bf16.mxu1 %v3831_v24  ;;  %v3803_v23 = vcombine.high %v331_v18, %v347_v19  ;;  %v362_v24 = vld [vmem:[#allocation2 + $0x220] sm:$0xff] }
  0x3e   :  { %v3832_v37 = vcombine.low %v362_v24, %v378_v25 }
  0x3f   :  { %1885 = vmatmul.mubr.bf16.gmra.mrb[4].mxu0 %v4133_v29  ;;  %1938 = vmatmul.mubr.bf16.gmra.mrb[4].mxu1 %v4133_v29 }
  0x40   :  { %1953 = vmatpush1.bf16.msra.mxu0 %v3828_v30  ;;  %2006 = vmatpush1.bf16.msra.mxu1 %v3830_v31  ;;  %v3802_v30 = vcombine.low %v331_v18, %v347_v19  ;;  %v3833_v31 = vcombine.high %v362_v24, %v378_v25  ;;  %v332_v19 = vld [vmem:[#allocation2 + $0x130] sm:$0xff] }
  0x41   :  { %1954 = vmatprep.subr.bf16.mxu0 %v3861_v32  ;;  %2007 = vmatprep.subr.bf16.mxu1 %v3863_v33  ;;  %v3835_v32 = vcombine.high %v363_v26, %v379_v27  ;;  %v394_v33 = vld [vmem:[#allocation2 + $0x320] sm:$0xff] }
  0x42   :  { %1980 = vmatprep.mubr.bf16.mxu0 %v4081_v0  ;;  %2033 = vmatprep.mubr.bf16.mxu1 %v4081_v0  ;;  %v3865_v39 = vcombine.high %v394_v33, %v410_v34  ;;  %v3864_v45 = vcombine.low %v394_v33, %v410_v34 }
  0x44   :  { %1955 = vmatpush1.bf16.msra.mxu0 %v3860_v38  ;;  %2008 = vmatpush1.bf16.msra.mxu1 %v3862_v40  ;;  %v3834_v38 = vcombine.low %v363_v26, %v379_v27  ;;  %v3867_v40 = vcombine.high %v395_v35, %v411_v36  ;;  %v364_v27 = vld [vmem:[#allocation2 + $0x230] sm:$0xff] }
  0x45   :  { %1956 = vmatprep.subr.bf16.mxu0 %v3893_v41  ;;  %2009 = vmatprep.subr.bf16.mxu1 %v3895_v42  ;;  %v426_v41 = vld [vmem:[#allocation2 + $0x420] sm:$0xff]  ;;  %v396_v36 = vld [vmem:[#allocation2 + $0x330] sm:$0xff] }
  0x46   :  { %v442_v42 = vld [vmem:[#allocation2 + $0x4a0] sm:$0xff] }
  0x47   :  { %v3896_v53 = vcombine.low %v426_v41, %v442_v42 }
  0x48   :  { %1957 = vmatpush1.bf16.msra.mxu0 %v3892_v47  ;;  %2010 = vmatpush1.bf16.msra.mxu1 %v3894_v49  ;;  %v3897_v47 = vcombine.high %v426_v41, %v442_v42  ;;  %v458_v49 = vld [vmem:[#allocation2 + $0x520] sm:$0xff] }
  0x49   :  { %1958 = vmatprep.subr.bf16.mxu0 %v3925_v50  ;;  %2011 = vmatprep.subr.bf16.mxu1 %v3927_v51  ;;  %v474_v50 = vld [vmem:[#allocation2 + $0x5a0] sm:$0xff]  ;;  %v459_v51 = vld [vmem:[#allocation2 + $0x528] sm:$0xff] }
  0x4a   :  { %v3929_v55 = vcombine.high %v458_v49, %v474_v50  ;;  %v3928_v61 = vcombine.low %v458_v49, %v474_v50  ;;  %v3930_v62 = vcombine.low %v459_v51, %v475_v52 }
  0x4c   :  { %1959 = vmatpush1.bf16.msra.mxu0 %v3924_v56  ;;  %2012 = vmatpush1.bf16.msra.mxu1 %v3926_v58  ;;  %v3931_v56 = vcombine.high %v459_v51, %v475_v52  ;;  %v506_v58 = vld [vmem:[#allocation2 + $0x6a0] sm:$0xff]  ;;  %v460_v52 = vld [vmem:[#allocation2 + $0x530] sm:$0xff] }
  0x4d   :  { %1960 = vmatprep.subr.bf16.mxu0 %v3957_v59  ;;  %2013 = vmatprep.subr.bf16.mxu1 %v3959_v60  ;;  %v491_v59 = vld [vmem:[#allocation2 + $0x628] sm:$0xff]  ;;  %v3961_v63 = vcombine.high %v490_v57, %v506_v58 }
  0x4e   :  { %v507_v60 = vld [vmem:[#allocation2 + $0x6a8] sm:$0xff] }
  0x4f   :  { %v3963_v1 = vcombine.high %v491_v59, %v507_v60  ;;  %v3962_v7 = vcombine.low %v491_v59, %v507_v60  ;;  %v492_v60 = vld [vmem:[#allocation2 + $0x630] sm:$0xff] }
  0x50   :  { %1961 = vmatpush1.bf16.msra.mxu0 %v3956_v3  ;;  %2014 = vmatpush1.bf16.msra.mxu1 %v3958_v4  ;;  %v538_v3 = vld [vmem:[#allocation2 + $0x7a0] sm:$0xff]  ;;  %v523_v4 = vld [vmem:[#allocation2 + $0x728] sm:$0xff] }
  0x51   :  { %1962 = vmatprep.subr.bf16.mxu0 %v3989_v5  ;;  %2015 = vmatprep.subr.bf16.mxu1 %v3991_v6  ;;  %v539_v5 = vld [vmem:[#allocation2 + $0x7a8] sm:$0xff]  ;;  %v3960_v6 = vcombine.low %v490_v57, %v506_v58  ;;  %v3993_v8 = vcombine.high %v522_v2, %v538_v3 }
  0x52   :  { %v3995_v9 = vcombine.high %v523_v4, %v539_v5  ;;  %v3994_v16 = vcombine.low %v523_v4, %v539_v5  ;;  %v524_v5 = vld [vmem:[#allocation2 + $0x730] sm:$0xff] }
  0x54   :  { %1963 = vmatpush1.bf16.msra.mxu0 %v3988_v12  ;;  %2016 = vmatpush1.bf16.msra.mxu1 %v3990_v13  ;;  %v316_v12 = vld [vmem:[#allocation2 + $0xb0] sm:$0xff]  ;;  %v301_v13 = vld [vmem:[#allocation2 + $0x38] sm:$0xff] }
  0x55   :  { %2054 = vmatprep.subr.bf16.mxu0 %v3769_v14  ;;  %2107 = vmatprep.subr.bf16.mxu1 %v3771_v15  ;;  %v317_v14 = vld [vmem:[#allocation2 + $0xb8] sm:$0xff]  ;;  %v3992_v15 = vcombine.low %v522_v2, %v538_v3  ;;  %v3773_v17 = vcombine.high %v300_v11, %v316_v12 }
  0x56   :  { %v3775_v18 = vcombine.high %v301_v13, %v317_v14  ;;  %v3774_v24 = vcombine.low %v301_v13, %v317_v14  ;;  %v302_v14 = vld [vmem:[#allocation2 + $0x40] sm:$0xff] }
  0x57   :  { %1981 = vmatmul.mubr.bf16.vlgmr.msra.gmra.mrb[8].mxu0 %v4124_v10  ;;  %2034 = vmatmul.mubr.bf16.vlgmr.msra.gmra.mrb[8].mxu1 %v4124_v10 }
  0x58   :  { %2055 = vmatpush1.bf16.msra.mxu0 %v3768_v20  ;;  %2108 = vmatpush1.bf16.msra.mxu1 %v3770_v21  ;;  %v348_v20 = vld [vmem:[#allocation2 + $0x1b0] sm:$0xff]  ;;  %v333_v21 = vld [vmem:[#allocation2 + $0x138] sm:$0xff] }
  0x59   :  { %2056 = vmatprep.subr.bf16.mxu0 %v3801_v22  ;;  %2109 = vmatprep.subr.bf16.mxu1 %v3803_v23  ;;  %v349_v22 = vld [vmem:[#allocation2 + $0x1b8] sm:$0xff]  ;;  %v3772_v23 = vcombine.low %v300_v11, %v316_v12  ;;  %v3805_v25 = vcombine.high %v332_v19, %v348_v20 }
  0x5a   :  { %1990 = vmatprep.mubr.bf16.mxu0 %v4081_v0  ;;  %2043 = vmatprep.mubr.bf16.mxu1 %v4081_v0  ;;  %v3807_v26 = vcombine.high %v333_v21, %v349_v22  ;;  %v3806_v33 = vcombine.low %v333_v21, %v349_v22  ;;  %v334_v22 = vld [vmem:[#allocation2 + $0x140] sm:$0xff] }
  0x5c   :  { %2057 = vmatpush1.bf16.msra.mxu0 %v3800_v28  ;;  %2110 = vmatpush1.bf16.msra.mxu1 %v3802_v30  ;;  %v380_v28 = vld [vmem:[#allocation2 + $0x2b0] sm:$0xff]  ;;  %v365_v30 = vld [vmem:[#allocation2 + $0x238] sm:$0xff] }
  0x5d   :  { %2058 = vmatprep.subr.bf16.mxu0 %v3833_v31  ;;  %2111 = vmatprep.subr.bf16.mxu1 %v3835_v32  ;;  %v381_v31 = vld [vmem:[#allocation2 + $0x2b8] sm:$0xff]  ;;  %v3804_v32 = vcombine.low %v332_v19, %v348_v20  ;;  %v3837_v34 = vcombine.high %v364_v27, %v380_v28 }
  0x5e   :  { %v3839_v35 = vcombine.high %v365_v30, %v381_v31  ;;  %v3838_v41 = vcombine.low %v365_v30, %v381_v31  ;;  %v366_v31 = vld [vmem:[#allocation2 + $0x240] sm:$0xff] }
  0x5f   :  { %1991 = vmatmul.mubr.bf16.gmra.mrb[12].mxu0 %v4133_v29  ;;  %2044 = vmatmul.mubr.bf16.gmra.mrb[12].mxu1 %v4133_v29 }
  0x60   :  { %2059 = vmatpush1.bf16.msra.mxu0 %v3832_v37  ;;  %2112 = vmatpush1.bf16.msra.mxu1 %v3834_v38  ;;  %v412_v37 = vld [vmem:[#allocation2 + $0x3b0] sm:$0xff]  ;;  %v397_v38 = vld [vmem:[#allocation2 + $0x338] sm:$0xff] }
  0x61   :  { %2060 = vmatprep.subr.bf16.mxu0 %v3865_v39  ;;  %2113 = vmatprep.subr.bf16.mxu1 %v3867_v40  ;;  %v413_v39 = vld [vmem:[#allocation2 + $0x3b8] sm:$0xff]  ;;  %v3836_v40 = vcombine.low %v364_v27, %v380_v28  ;;  %v3869_v42 = vcombine.high %v396_v36, %v412_v37 }
  0x62   :  { %2086 = vmatprep.mubr.bf16.mxu0 %v4081_v0  ;;  %2139 = vmatprep.mubr.bf16.mxu1 %v4081_v0  ;;  %v3871_v43 = vcombine.high %v397_v38, %v413_v39  ;;  %v3870_v49 = vcombine.low %v397_v38, %v413_v39  ;;  %v398_v39 = vld [vmem:[#allocation2 + $0x340] sm:$0xff] }
  0x64   :  { %2061 = vmatpush1.bf16.msra.mxu0 %v3864_v45  ;;  %2114 = vmatpush1.bf16.msra.mxu1 %v3866_v46  ;;  %v444_v45 = vld [vmem:[#allocation2 + $0x4b0] sm:$0xff]  ;;  %v429_v46 = vld [vmem:[#allocation2 + $0x438] sm:$0xff] }
  0x65   :  { %2062 = vmatprep.subr.bf16.mxu0 %v3897_v47  ;;  %2115 = vmatprep.subr.bf16.mxu1 %v3899_v48  ;;  %v445_v47 = vld [vmem:[#allocation2 + $0x4b8] sm:$0xff]  ;;  %v3868_v48 = vcombine.low %v396_v36, %v412_v37  ;;  %v3901_v50 = vcombine.high %v428_v44, %v444_v45 }
  0x66   :  { %v3903_v51 = vcombine.high %v429_v46, %v445_v47  ;;  %v3902_v57 = vcombine.low %v429_v46, %v445_v47  ;;  %v430_v47 = vld [vmem:[#allocation2 + $0x440] sm:$0xff] }
  0x68   :  { %2063 = vmatpush1.bf16.msra.mxu0 %v3896_v53  ;;  %2116 = vmatpush1.bf16.msra.mxu1 %v3898_v54  ;;  %v476_v53 = vld [vmem:[#allocation2 + $0x5b0] sm:$0xff]  ;;  %v461_v54 = vld [vmem:[#allocation2 + $0x538] sm:$0xff] }
  0x69   :  { %2064 = vmatprep.subr.bf16.mxu0 %v3929_v55  ;;  %2117 = vmatprep.subr.bf16.mxu1 %v3931_v56  ;;  %v477_v55 = vld [vmem:[#allocation2 + $0x5b8] sm:$0xff]  ;;  %v3900_v56 = vcombine.low %v428_v44, %v444_v45  ;;  %v3933_v58 = vcombine.high %v460_v52, %v476_v53 }
  0x6a   :  { %v3935_v59 = vcombine.high %v461_v54, %v477_v55  ;;  %v3934_v2 = vcombine.low %v461_v54, %v477_v55  ;;  %v462_v55 = vld [vmem:[#allocation2 + $0x540] sm:$0xff] }
  0x6c   :  { %2065 = vmatpush1.bf16.msra.mxu0 %v3928_v61  ;;  %2118 = vmatpush1.bf16.msra.mxu1 %v3930_v62  ;;  %v508_v61 = vld [vmem:[#allocation2 + $0x6b0] sm:$0xff]  ;;  %v493_v62 = vld [vmem:[#allocation2 + $0x638] sm:$0xff] }
  0x6d   :  { %2066 = vmatprep.subr.bf16.mxu0 %v3961_v63  ;;  %2119 = vmatprep.subr.bf16.mxu1 %v3963_v1  ;;  %v509_v63 = vld [vmem:[#allocation2 + $0x6b8] sm:$0xff]  ;;  %v3932_v1 = vcombine.low %v460_v52, %v476_v53  ;;  %v3965_v3 = vcombine.high %v492_v60, %v508_v61 }
  0x6e   :  { %v3967_v4 = vcombine.high %v493_v62, %v509_v63  ;;  %v3966_v11 = vcombine.low %v493_v62, %v509_v63  ;;  %v494_v63 = vld [vmem:[#allocation2 + $0x640] sm:$0xff] }
  0x70   :  { %2067 = vmatpush1.bf16.msra.mxu0 %v3960_v6  ;;  %2120 = vmatpush1.bf16.msra.mxu1 %v3962_v7  ;;  %v540_v6 = vld [vmem:[#allocation2 + $0x7b0] sm:$0xff]  ;;  %v525_v7 = vld [vmem:[#allocation2 + $0x738] sm:$0xff] }
  0x71   :  { %2068 = vmatprep.subr.bf16.mxu0 %v3993_v8  ;;  %2121 = vmatprep.subr.bf16.mxu1 %v3995_v9  ;;  %v541_v8 = vld [vmem:[#allocation2 + $0x7b8] sm:$0xff]  ;;  %v3964_v9 = vcombine.low %v492_v60, %v508_v61  ;;  %v3997_v12 = vcombine.high %v524_v5, %v540_v6 }
  0x72   :  { %v3999_v13 = vcombine.high %v525_v7, %v541_v8  ;;  %v3998_v19 = vcombine.low %v525_v7, %v541_v8  ;;  %v526_v8 = vld [vmem:[#allocation2 + $0x740] sm:$0xff] }
  0x74   :  { %2069 = vmatpush1.bf16.msra.mxu0 %v3992_v15  ;;  %2122 = vmatpush1.bf16.msra.mxu1 %v3994_v16  ;;  %v318_v15 = vld [vmem:[#allocation2 + $0xc0] sm:$0xff]  ;;  %v303_v16 = vld [vmem:[#allocation2 + $0x48] sm:$0xff] }
  0x75   :  { %2160 = vmatprep.subr.bf16.mxu0 %v3773_v17  ;;  %2213 = vmatprep.subr.bf16.mxu1 %v3775_v18  ;;  %v319_v17 = vld [vmem:[#allocation2 + $0xc8] sm:$0xff]  ;;  %v3996_v18 = vcombine.low %v524_v5, %v540_v6  ;;  %v3777_v20 = vcombine.high %v302_v14, %v318_v15 }
  0x76   :  { %v3779_v21 = vcombine.high %v303_v16, %v319_v17  ;;  %v3778_v27 = vcombine.low %v303_v16, %v319_v17  ;;  %v304_v17 = vld [vmem:[#allocation2 + $0x50] sm:$0xff] }
  0x77   :  { %2087 = vmatmul.mubr.bf16.vlgmr.msra.gmra.mrb[16].mxu0 %v4124_v10  ;;  %2140 = vmatmul.mubr.bf16.vlgmr.msra.gmra.mrb[16].mxu1 %v4124_v10 }
  0x78   :  { %2161 = vmatpush1.bf16.msra.mxu0 %v3772_v23  ;;  %2214 = vmatpush1.bf16.msra.mxu1 %v3774_v24  ;;  %v350_v23 = vld [vmem:[#allocation2 + $0x1c0] sm:$0xff]  ;;  %v335_v24 = vld [vmem:[#allocation2 + $0x148] sm:$0xff] }
  0x79   :  { %2162 = vmatprep.subr.bf16.mxu0 %v3805_v25  ;;  %2215 = vmatprep.subr.bf16.mxu1 %v3807_v26  ;;  %v351_v25 = vld [vmem:[#allocation2 + $0x1c8] sm:$0xff]  ;;  %v3776_v26 = vcombine.low %v302_v14, %v318_v15  ;;  %v3809_v28 = vcombine.high %v334_v22, %v350_v23 }
  0x7a   :  { %2096 = vmatprep.mubr.bf16.mxu0 %v4081_v0  ;;  %2149 = vmatprep.mubr.bf16.mxu1 %v4081_v0  ;;  %v3811_v30 = vcombine.high %v335_v24, %v351_v25  ;;  %v3810_v36 = vcombine.low %v335_v24, %v351_v25  ;;  %v336_v25 = vld [vmem:[#allocation2 + $0x150] sm:$0xff] }
  0x7c   :  { %2163 = vmatpush1.bf16.msra.mxu0 %v3804_v32  ;;  %2216 = vmatpush1.bf16.msra.mxu1 %v3806_v33  ;;  %v382_v32 = vld [vmem:[#allocation2 + $0x2c0] sm:$0xff]  ;;  %v367_v33 = vld [vmem:[#allocation2 + $0x248] sm:$0xff] }
  0x7d   :  { %2164 = vmatprep.subr.bf16.mxu0 %v3837_v34  ;;  %2217 = vmatprep.subr.bf16.mxu1 %v3839_v35  ;;  %v383_v34 = vld [vmem:[#allocation2 + $0x2c8] sm:$0xff]  ;;  %v3808_v35 = vcombine.low %v334_v22, %v350_v23  ;;  %v3841_v37 = vcombine.high %v366_v31, %v382_v32 }
  0x7e   :  { %v3843_v38 = vcombine.high %v367_v33, %v383_v34  ;;  %v3842_v44 = vcombine.low %v367_v33, %v383_v34  ;;  %v368_v34 = vld [vmem:[#allocation2 + $0x250] sm:$0xff] }
  0x7f   :  { %2097 = vmatmul.mubr.bf16.gmra.mrb[20].mxu0 %v4133_v29  ;;  %2150 = vmatmul.mubr.bf16.gmra.mrb[20].mxu1 %v4133_v29 }
  0x80   :  { %2165 = vmatpush1.bf16.msra.mxu0 %v3836_v40  ;;  %2218 = vmatpush1.bf16.msra.mxu1 %v3838_v41  ;;  %v414_v40 = vld [vmem:[#allocation2 + $0x3c0] sm:$0xff]  ;;  %v399_v41 = vld [vmem:[#allocation2 + $0x348] sm:$0xff] }
  0x81   :  { %2166 = vmatprep.subr.bf16.mxu0 %v3869_v42  ;;  %2219 = vmatprep.subr.bf16.mxu1 %v3871_v43  ;;  %v415_v42 = vld [vmem:[#allocation2 + $0x3c8] sm:$0xff]  ;;  %v3840_v43 = vcombine.low %v366_v31, %v382_v32  ;;  %v3873_v45 = vcombine.high %v398_v39, %v414_v40 }
  0x82   :  { %2192 = vmatprep.mubr.bf16.mxu0 %v4081_v0  ;;  %2245 = vmatprep.mubr.bf16.mxu1 %v4081_v0  ;;  %v3875_v46 = vcombine.high %v399_v41, %v415_v42  ;;  %v3874_v52 = vcombine.low %v399_v41, %v415_v42  ;;  %v400_v42 = vld [vmem:[#allocation2 + $0x350] sm:$0xff] }
  0x84   :  { %2167 = vmatpush1.bf16.msra.mxu0 %v3868_v48  ;;  %2220 = vmatpush1.bf16.msra.mxu1 %v3870_v49  ;;  %v446_v48 = vld [vmem:[#allocation2 + $0x4c0] sm:$0xff]  ;;  %v431_v49 = vld [vmem:[#allocation2 + $0x448] sm:$0xff] }
  0x85   :  { %2168 = vmatprep.subr.bf16.mxu0 %v3901_v50  ;;  %2221 = vmatprep.subr.bf16.mxu1 %v3903_v51  ;;  %v447_v50 = vld [vmem:[#allocation2 + $0x4c8] sm:$0xff]  ;;  %v3872_v51 = vcombine.low %v398_v39, %v414_v40  ;;  %v3905_v53 = vcombine.high %v430_v47, %v446_v48 }
  0x86   :  { %v3907_v54 = vcombine.high %v431_v49, %v447_v50  ;;  %v3906_v60 = vcombine.low %v431_v49, %v447_v50  ;;  %v432_v49 = vld [vmem:[#allocation2 + $0x450] sm:$0xff] }
  0x87   :  { %v448_v50 = vld [vmem:[#allocation2 + $0x4d0] sm:$0xff] }
  0x88   :  { %2169 = vmatpush1.bf16.msra.mxu0 %v3900_v56  ;;  %2222 = vmatpush1.bf16.msra.mxu1 %v3902_v57  ;;  %v478_v56 = vld [vmem:[#allocation2 + $0x5c0] sm:$0xff]  ;;  %v463_v57 = vld [vmem:[#allocation2 + $0x548] sm:$0xff] }
  0x89   :  { %2170 = vmatprep.subr.bf16.mxu0 %v3933_v58  ;;  %2223 = vmatprep.subr.bf16.mxu1 %v3935_v59  ;;  %v479_v58 = vld [vmem:[#allocation2 + $0x5c8] sm:$0xff]  ;;  %v3904_v59 = vcombine.low %v430_v47, %v446_v48  ;;  %v3937_v61 = vcombine.high %v462_v55, %v478_v56 }
  0x8a   :  { %v3939_v62 = vcombine.high %v463_v57, %v479_v58  ;;  %v3938_v5 = vcombine.low %v463_v57, %v479_v58  ;;  %v464_v57 = vld [vmem:[#allocation2 + $0x550] sm:$0xff] }
  0x8b   :  { %v480_v58 = vld [vmem:[#allocation2 + $0x5d0] sm:$0xff] }
  0x8c   :  { %2171 = vmatpush1.bf16.msra.mxu0 %v3932_v1  ;;  %2224 = vmatpush1.bf16.msra.mxu1 %v3934_v2  ;;  %v510_v1 = vld [vmem:[#allocation2 + $0x6c0] sm:$0xff]  ;;  %v495_v2 = vld [vmem:[#allocation2 + $0x648] sm:$0xff] }
  0x8d   :  { %2172 = vmatprep.subr.bf16.mxu0 %v3965_v3  ;;  %2225 = vmatprep.subr.bf16.mxu1 %v3967_v4  ;;  %v511_v3 = vld [vmem:[#allocation2 + $0x6c8] sm:$0xff]  ;;  %v3936_v4 = vcombine.low %v462_v55, %v478_v56  ;;  %v3969_v6 = vcombine.high %v494_v63, %v510_v1  ;;  %v3909_v55 = vcombine.high %v432_v49, %v448_v50 }
  0x8e   :  { %v3971_v7 = vcombine.high %v495_v2, %v511_v3  ;;  %v3970_v14 = vcombine.low %v495_v2, %v511_v3  ;;  %v512_v2 = vld [vmem:[#allocation2 + $0x6d0] sm:$0xff]  ;;  %v497_v3 = vld [vmem:[#allocation2 + $0x658] sm:$0xff] }
  0x90   :  { %2173 = vmatpush1.bf16.msra.mxu0 %v3964_v9  ;;  %2226 = vmatpush1.bf16.msra.mxu1 %v3966_v11  ;;  %v542_v9 = vld [vmem:[#allocation2 + $0x7c0] sm:$0xff]  ;;  %v527_v11 = vld [vmem:[#allocation2 + $0x748] sm:$0xff] }
  0x91   :  { %2174 = vmatprep.subr.bf16.mxu0 %v3997_v12  ;;  %2227 = vmatprep.subr.bf16.mxu1 %v3999_v13  ;;  %v543_v12 = vld [vmem:[#allocation2 + $0x7c8] sm:$0xff]  ;;  %v3968_v13 = vcombine.low %v494_v63, %v510_v1  ;;  %v4001_v15 = vcombine.high %v526_v8, %v542_v9  ;;  %v496_v1 = vld [vmem:[#allocation2 + $0x650] sm:$0xff] }
  0x92   :  { %v4003_v16 = vcombine.high %v527_v11, %v543_v12  ;;  %v4002_v22 = vcombine.low %v527_v11, %v543_v12  ;;  %v544_v11 = vld [vmem:[#allocation2 + $0x7d0] sm:$0xff]  ;;  %v529_v12 = vld [vmem:[#allocation2 + $0x758] sm:$0xff] }
  0x94   :  { %2175 = vmatpush1.bf16.msra.mxu0 %v3996_v18  ;;  %2228 = vmatpush1.bf16.msra.mxu1 %v3998_v19  ;;  %v320_v18 = vld [vmem:[#allocation2 + $0xd0] sm:$0xff]  ;;  %v305_v19 = vld [vmem:[#allocation2 + $0x58] sm:$0xff] }
  0x95   :  { %2266 = vmatprep.subr.bf16.mxu0 %v3777_v20  ;;  %2319 = vmatprep.subr.bf16.mxu1 %v3779_v21  ;;  %v321_v20 = vld [vmem:[#allocation2 + $0xd8] sm:$0xff]  ;;  %v4000_v21 = vcombine.low %v526_v8, %v542_v9  ;;  %v3781_v23 = vcombine.high %v304_v17, %v320_v18  ;;  %v528_v9 = vld [vmem:[#allocation2 + $0x750] sm:$0xff] }
  0x96   :  { %v3783_v24 = vcombine.high %v305_v19, %v321_v20  ;;  %v3782_v31 = vcombine.low %v305_v19, %v321_v20  ;;  %v322_v19 = vld [vmem:[#allocation2 + $0xe0] sm:$0xff]  ;;  %v307_v20 = vld [vmem:[#allocation2 + $0x68] sm:$0xff] }
  0x97   :  { %2193 = vmatmul.mubr.bf16.vlgmr.msra.gmra.mrb[24].mxu0 %v4124_v10  ;;  %2246 = vmatmul.mubr.bf16.vlgmr.msra.gmra.mrb[24].mxu1 %v4124_v10 }
  0x98   :  { %2267 = vmatpush1.bf16.msra.mxu0 %v3776_v26  ;;  %2320 = vmatpush1.bf16.msra.mxu1 %v3778_v27  ;;  %v352_v26 = vld [vmem:[#allocation2 + $0x1d0] sm:$0xff]  ;;  %v337_v27 = vld [vmem:[#allocation2 + $0x158] sm:$0xff] }
  0x99   :  { %2268 = vmatprep.subr.bf16.mxu0 %v3809_v28  ;;  %2321 = vmatprep.subr.bf16.mxu1 %v3811_v30  ;;  %v353_v28 = vld [vmem:[#allocation2 + $0x1d8] sm:$0xff]  ;;  %v3780_v30 = vcombine.low %v304_v17, %v320_v18  ;;  %v3813_v32 = vcombine.high %v336_v25, %v352_v26  ;;  %v306_v18 = vld [vmem:[#allocation2 + $0x60] sm:$0xff] }
  0x9a   :  { %2202 = vmatprep.mubr.bf16.mxu0 %v4081_v0  ;;  %2255 = vmatprep.mubr.bf16.mxu1 %v4081_v0  ;;  %v3815_v33 = vcombine.high %v337_v27, %v353_v28  ;;  %v3814_v39 = vcombine.low %v337_v27, %v353_v28  ;;  %v354_v27 = vld [vmem:[#allocation2 + $0x1e0] sm:$0xff]  ;;  %v339_v28 = vld [vmem:[#allocation2 + $0x168] sm:$0xff] }
  0x9c   :  { %2269 = vmatpush1.bf16.msra.mxu0 %v3808_v35  ;;  %2322 = vmatpush1.bf16.msra.mxu1 %v3810_v36  ;;  %v384_v35 = vld [vmem:[#allocation2 + $0x2d0] sm:$0xff]  ;;  %v369_v36 = vld [vmem:[#allocation2 + $0x258] sm:$0xff] }
  0x9d   :  { %2270 = vmatprep.subr.bf16.mxu0 %v3841_v37  ;;  %2323 = vmatprep.subr.bf16.mxu1 %v3843_v38  ;;  %v385_v37 = vld [vmem:[#allocation2 + $0x2d8] sm:$0xff]  ;;  %v3812_v38 = vcombine.low %v336_v25, %v352_v26  ;;  %v3845_v40 = vcombine.high %v368_v34, %v384_v35  ;;  %v338_v26 = vld [vmem:[#allocation2 + $0x160] sm:$0xff] }
  0x9e   :  { %v3847_v41 = vcombine.high %v369_v36, %v385_v37 }
  0x9f   :  { %2203 = vmatmul.mubr.bf16.gmra.mrb[28].mxu0 %v4133_v29  ;;  %2256 = vmatmul.mubr.bf16.gmra.mrb[28].mxu1 %v4133_v29 }
  0xa0   :  { %2271 = vmatpush1.bf16.msra.mxu0 %v3840_v43  ;;  %2324 = vmatpush1.bf16.msra.mxu1 %v3842_v44  ;;  %v416_v43 = vld [vmem:[#allocation2 + $0x3d0] sm:$0xff]  ;;  %v401_v44 = vld [vmem:[#allocation2 + $0x358] sm:$0xff] }
  0xa1   :  { %2272 = vmatprep.subr.bf16.mxu0 %v3873_v45  ;;  %2325 = vmatprep.subr.bf16.mxu1 %v3875_v46  ;;  %v417_v45 = vld [vmem:[#allocation2 + $0x3d8] sm:$0xff]  ;;  %v3844_v46 = vcombine.low %v368_v34, %v384_v35  ;;  %v3877_v47 = vcombine.high %v400_v42, %v416_v43  ;;  %v370_v35 = vld [vmem:[#allocation2 + $0x260] sm:$0xff] }
  0xa2   :  { %2298 = vmatprep.mubr.bf16.mxu0 %v4081_v0  ;;  %2351 = vmatprep.mubr.bf16.mxu1 %v4081_v0  ;;  %v3879_v48 = vcombine.high %v401_v44, %v417_v45 }
  0xa4   :  { %2273 = vmatpush1.bf16.msra.mxu0 %v3872_v51  ;;  %2326 = vmatpush1.bf16.msra.mxu1 %v3874_v52  ;;  %v433_v51 = vld [vmem:[#allocation2 + $0x458] sm:$0xff] }
  0xa5   :  { %2274 = vmatprep.subr.bf16.mxu0 %v3905_v53  ;;  %2327 = vmatprep.subr.bf16.mxu1 %v3907_v54  ;;  %v449_v52 = vld [vmem:[#allocation2 + $0x4d8] sm:$0xff]  ;;  %v3876_v53 = vcombine.low %v400_v42, %v416_v43  ;;  %v3878_v54 = vcombine.low %v401_v44, %v417_v45  ;;  %v402_v44 = vld [vmem:[#allocation2 + $0x360] sm:$0xff] }
  0xa6   :  { %v3911_v56 = vcombine.high %v433_v51, %v449_v52  ;;  %v418_v45 = vld [vmem:[#allocation2 + $0x3e0] sm:$0xff] }
  0xa8   :  { %2275 = vmatpush1.bf16.msra.mxu0 %v3904_v59  ;;  %2328 = vmatpush1.bf16.msra.mxu1 %v3906_v60  ;;  %v465_v59 = vld [vmem:[#allocation2 + $0x558] sm:$0xff] }
  0xa9   :  { %2276 = vmatprep.subr.bf16.mxu0 %v3937_v61  ;;  %2329 = vmatprep.subr.bf16.mxu1 %v3939_v62  ;;  %v481_v60 = vld [vmem:[#allocation2 + $0x5d8] sm:$0xff]  ;;  %v3908_v61 = vcombine.low %v432_v49, %v448_v50  ;;  %v3910_v62 = vcombine.low %v433_v51, %v449_v52  ;;  %v3881_v49 = vcombine.high %v402_v44, %v418_v45  ;;  %v434_v51 = vld [vmem:[#allocation2 + $0x460] sm:$0xff] }
  0xaa   :  { %v3943_v63 = vcombine.high %v465_v59, %v481_v60  ;;  %v450_v52 = vld [vmem:[#allocation2 + $0x4e0] sm:$0xff] }
  0xac   :  { %2277 = vmatpush1.bf16.msra.mxu0 %v3936_v4  ;;  %2330 = vmatpush1.bf16.msra.mxu1 %v3938_v5  ;;  %v513_v4 = vld [vmem:[#allocation2 + $0x6d8] sm:$0xff]  ;;  %v3940_v5 = vcombine.low %v464_v57, %v480_v58 }
  0xad   :  { %2278 = vmatprep.subr.bf16.mxu0 %v3969_v6  ;;  %2331 = vmatprep.subr.bf16.mxu1 %v3971_v7  ;;  %v3942_v6 = vcombine.low %v465_v59, %v481_v60  ;;  %v3973_v7 = vcombine.high %v496_v1, %v512_v2  ;;  %v3975_v8 = vcombine.high %v497_v3, %v513_v4  ;;  %v466_v60 = vld [vmem:[#allocation2 + $0x560] sm:$0xff] }
  0xb0   :  { %2279 = vmatpush1.bf16.msra.mxu0 %v3968_v13  ;;  %2332 = vmatpush1.bf16.msra.mxu1 %v3970_v14  ;;  %v545_v13 = vld [vmem:[#allocation2 + $0x7d8] sm:$0xff]  ;;  %v3972_v14 = vcombine.low %v496_v1, %v512_v2 }
  0xb1   :  { %2280 = vmatprep.subr.bf16.mxu0 %v4001_v15  ;;  %2333 = vmatprep.subr.bf16.mxu1 %v4003_v16  ;;  %v3974_v15 = vcombine.low %v497_v3, %v513_v4  ;;  %v4005_v16 = vcombine.high %v528_v9, %v544_v11  ;;  %v4007_v17 = vcombine.high %v529_v12, %v545_v13  ;;  %v498_v4 = vld [vmem:[#allocation2 + $0x660] sm:$0xff] }
  0xb4   :  { %2281 = vmatpush1.bf16.msra.mxu0 %v4000_v21  ;;  %2334 = vmatpush1.bf16.msra.mxu1 %v4002_v22  ;;  %v323_v21 = vld [vmem:[#allocation2 + $0xe8] sm:$0xff]  ;;  %v4004_v22 = vcombine.low %v528_v9, %v544_v11 }
  0xb5   :  { %2372 = vmatprep.subr.bf16.mxu0 %v3781_v23  ;;  %2425 = vmatprep.subr.bf16.mxu1 %v3783_v24  ;;  %v4006_v23 = vcombine.low %v529_v12, %v545_v13  ;;  %v3785_v24 = vcombine.high %v306_v18, %v322_v19  ;;  %v3787_v25 = vcombine.high %v307_v20, %v323_v21  ;;  %v530_v13 = vld [vmem:[#allocation2 + $0x760] sm:$0xff] }
  0xb7   :  { %2299 = vmatmul.mubr.bf16.vlgmr.msra.gmra.mrb[32].mxu0 %v4124_v10  ;;  %2352 = vmatmul.mubr.bf16.vlgmr.msra.gmra.mrb[32].mxu1 %v4124_v10  ;;  %v3846_v10 = vcombine.low %v369_v36, %v385_v37  ;;  %v386_v36 = vld [vmem:[#allocation2 + $0x2e0] sm:$0xff] }
  0xb8   :  { %2373 = vmatpush1.bf16.msra.mxu0 %v3780_v30  ;;  %2426 = vmatpush1.bf16.msra.mxu1 %v3782_v31  ;;  %v355_v30 = vld [vmem:[#allocation2 + $0x1e8] sm:$0xff]  ;;  %v3784_v31 = vcombine.low %v306_v18, %v322_v19  ;;  %v4186_v37 = vld [vmem:[%s4371_s0] sm:$0xff]   ;;  %v3849_v42 = vcombine.high %v370_v35, %v386_v36 }
  0xb9   :  { %2374 = vmatprep.subr.bf16.mxu0 %v3813_v32  ;;  %2427 = vmatprep.subr.bf16.mxu1 %v3815_v33  ;;  %v3786_v32 = vcombine.low %v307_v20, %v323_v21  ;;  %v3817_v33 = vcombine.high %v338_v26, %v354_v27  ;;  %v3819_v34 = vcombine.high %v339_v28, %v355_v30  ;;  %v308_v21 = vld [vmem:[#allocation2 + $0x70] sm:$0xff] }
  0xba   :  { %2308 = vmatprep.mubr.bf16.mxu0 %v4081_v0  ;;  %2361 = vmatprep.mubr.bf16.mxu1 %v4081_v0 }
  0xbc   :  { %2375 = vmatpush1.bf16.msra.mxu0 %v3812_v38  ;;  %2428 = vmatpush1.bf16.msra.mxu1 %v3814_v39  ;;  %v371_v38 = vld [vmem:[#allocation2 + $0x268] sm:$0xff] }
  0xbd   :  { %2376 = vmatprep.subr.bf16.mxu0 %v3845_v40  ;;  %2429 = vmatprep.subr.bf16.mxu1 %v3847_v41  ;;  %v387_v39 = vld [vmem:[#allocation2 + $0x2e8] sm:$0xff]  ;;  %v3816_v40 = vcombine.low %v338_v26, %v354_v27  ;;  %v3818_v41 = vcombine.low %v339_v28, %v355_v30  ;;  %v340_v30 = vld [vmem:[#allocation2 + $0x170] sm:$0xff] }
  0xbe   :  { %v3851_v43 = vcombine.high %v371_v38, %v387_v39 }
  0xbf   :  { %2309 = vmatmul.mubr.bf16.gmra.mrb[36].mxu0 %v4133_v29  ;;  %2362 = vmatmul.mubr.bf16.gmra.mrb[36].mxu1 %v4133_v29  ;;  %v3941_v29 = vcombine.high %v464_v57, %v480_v58  ;;  %v3913_v58 = vcombine.high %v434_v51, %v450_v52 }
  0xc0   :  { %2377 = vmatpush1.bf16.msra.mxu0 %v3844_v46  ;;  %2430 = vmatpush1.bf16.msra.mxu1 %v3846_v10  ;;  %v403_v46 = vld [vmem:[#allocation2 + $0x368] sm:$0xff] }
  0xc1   :  { %2378 = vmatprep.subr.bf16.mxu0 %v3877_v47  ;;  %2431 = vmatprep.subr.bf16.mxu1 %v3879_v48  ;;  %v419_v10 = vld [vmem:[#allocation2 + $0x3e8] sm:$0xff]  ;;  %v3848_v47 = vcombine.low %v370_v35, %v386_v36  ;;  %v3850_v48 = vcombine.low %v371_v38, %v387_v39  ;;  %v372_v39 = vld [vmem:[#allocation2 + $0x270] sm:$0xff] }
  0xc2   :  { %2404 = vmatprep.mubr.bf16.mxu0 %v4081_v0  ;;  %2457 = vmatprep.mubr.bf16.mxu1 %v4081_v0  ;;  %v3883_v50 = vcombine.high %v403_v46, %v419_v10  ;;  %v3882_v57 = vcombine.low %v403_v46, %v419_v10  ;;  %v404_v10 = vld [vmem:[#allocation2 + $0x370] sm:$0xff] }
  0xc4   :  { %2379 = vmatpush1.bf16.msra.mxu0 %v3876_v53  ;;  %2432 = vmatpush1.bf16.msra.mxu1 %v3878_v54  ;;  %v435_v53 = vld [vmem:[#allocation2 + $0x468] sm:$0xff] }
  0xc5   :  { %2380 = vmatprep.subr.bf16.mxu0 %v3909_v55  ;;  %2433 = vmatprep.subr.bf16.mxu1 %v3911_v56  ;;  %v451_v54 = vld [vmem:[#allocation2 + $0x4e8] sm:$0xff]  ;;  %v3880_v56 = vcombine.low %v402_v44, %v418_v45 }
  0xc6   :  { %v4195_v55 = vld [vmem:[%s4371_s0 + $0x8] sm:$0xff]   ;;  %v3915_v59 = vcombine.high %v435_v53, %v451_v54  ;;  %v3914_v1 = vcombine.low %v435_v53, %v451_v54  ;;  %v436_v54 = vld [vmem:[#allocation2 + $0x470] sm:$0xff]  ;;  %s4082_s0 = smov [#allocation5]  }
  0xc7   :  { %s3746_s13 = sshll.u32 %s4082_s0, 4  ;;  %s3747_s13 = int_to_ptr.vmem [resolvable:$true] %s3746_s13 }
  0xc8   :  { %2381 = vmatpush1.bf16.msra.mxu0 %v3908_v61  ;;  %2434 = vmatpush1.bf16.msra.mxu1 %v3910_v62  ;;  %v482_v61 = vld [vmem:[#allocation2 + $0x5e0] sm:$0xff]  ;;  %v467_v62 = vld [vmem:[#allocation2 + $0x568] sm:$0xff]  ;;  %s4052_s14 = scalar_lea.vmem %s3747_s13, 16384  ;;  %p4057_p9 = scmp.lt.s32.totalorder %s3747_s13, %s3747_s13 }
  0xc9   :  { %2382 = vmatprep.subr.bf16.mxu0 %v3941_v29  ;;  %2435 = vmatprep.subr.bf16.mxu1 %v3943_v63  ;;  %v483_v29 = vld [vmem:[#allocation2 + $0x5e8] sm:$0xff]  ;;  %v3912_v63 = vcombine.low %v434_v51, %v450_v52  ;;  %v3945_v2 = vcombine.high %v466_v60, %v482_v61  ;;  %p4053_p8 = scmp.ne.s32.totalorder %s3747_s13, %s4052_s14  ;;  %p4058_p10 = scmp.lt.s32.totalorder %s4052_s14, %s4052_s14 }
  0xca   :  { %v3947_v3 = vcombine.high %v467_v62, %v483_v29  ;;  %v3946_v9 = vcombine.low %v467_v62, %v483_v29  ;;  %v468_v29 = vld [vmem:[#allocation2 + $0x570] sm:$0xff] }
  0xcb   :  { %p4059_p11 = por %p4058_p10, %p4057_p9 }
  0xcc   :  { %2383 = vmatpush1.bf16.msra.mxu0 %v3940_v5  ;;  %2436 = vmatpush1.bf16.msra.mxu1 %v3942_v6  ;;  %v514_v5 = vld [vmem:[#allocation2 + $0x6e0] sm:$0xff]  ;;  %v499_v6 = vld [vmem:[#allocation2 + $0x668] sm:$0xff] }
  0xcd   :  { %2384 = vmatprep.subr.bf16.mxu0 %v3973_v7  ;;  %2437 = vmatprep.subr.bf16.mxu1 %v3975_v8  ;;  %v515_v7 = vld [vmem:[#allocation2 + $0x6e8] sm:$0xff]  ;;  %v3944_v8 = vcombine.low %v466_v60, %v482_v61  ;;  %v3977_v11 = vcombine.high %v498_v4, %v514_v5  ;;  %p4060_p12 = pnand %p4059_p11, %p4053_p8 }
  0xce   :  { %v3979_v12 = vcombine.high %v499_v6, %v515_v7  ;;  %v3978_v18 = vcombine.low %v499_v6, %v515_v7 }
  0xd0   :  { %2385 = vmatpush1.bf16.msra.mxu0 %v3972_v14  ;;  %2438 = vmatpush1.bf16.msra.mxu1 %v3974_v15  ;;  %v546_v14 = vld [vmem:[#allocation2 + $0x7e0] sm:$0xff]  ;;  %v531_v15 = vld [vmem:[#allocation2 + $0x768] sm:$0xff] }
  0xd1   :  { %2386 = vmatprep.subr.bf16.mxu0 %v4005_v16  ;;  %2439 = vmatprep.subr.bf16.mxu1 %v4007_v17  ;;  %v547_v16 = vld [vmem:[#allocation2 + $0x7e8] sm:$0xff]  ;;  %v3976_v17 = vcombine.low %v498_v4, %v514_v5  ;;  %v4009_v19 = vcombine.high %v530_v13, %v546_v14  ;;  %v4209_v4 = vpop.permute.xlu0 %3083 }
  0xd2   :  { %v4011_v20 = vcombine.high %v531_v15, %v547_v16  ;;  %v4010_v26 = vcombine.low %v531_v15, %v547_v16  ;;  %v548_v15 = vld [vmem:[#allocation2 + $0x7f0] sm:$0xff] }
  0xd4   :  { %2387 = vmatpush1.bf16.msra.mxu0 %v4004_v22  ;;  %2440 = vmatpush1.bf16.msra.mxu1 %v4006_v23  ;;  %v324_v22 = vld [vmem:[#allocation2 + $0xf0] sm:$0xff]  ;;  %v309_v23 = vld [vmem:[#allocation2 + $0x78] sm:$0xff] }
  0xd5   :  { %2478 = vmatprep.subr.bf16.mxu0 %v3785_v24  ;;  %2531 = vmatprep.subr.bf16.mxu1 %v3787_v25  ;;  %v325_v24 = vld [vmem:[#allocation2 + $0xf8] sm:$0xff]  ;;  %v4008_v25 = vcombine.low %v530_v13, %v546_v14  ;;  %v3789_v27 = vcombine.high %v308_v21, %v324_v22  ;;  %v4211_v14 = vld [vmem:[#allocation2 + $0x770] sm:$0xff] }
  0xd6   :  { %v3791_v28 = vcombine.high %v309_v23, %v325_v24  ;;  %v3790_v35 = vcombine.low %v309_v23, %v325_v24  ;;  %v4215_v23 = vpop.permute.xlu0 %3088 }
  0xd7   :  { %2405 = vmatmul.mubr.bf16.vlgmr.msra.gmra.mrb[40].mxu0 %v4186_v37  ;;  %2458 = vmatmul.mubr.bf16.vlgmr.msra.gmra.mrb[40].mxu1 %v4186_v37 }
  0xd8   :  { %2479 = vmatpush1.bf16.msra.mxu0 %v3784_v31  ;;  %2532 = vmatpush1.bf16.msra.mxu1 %v3786_v32  ;;  %v356_v31 = vld [vmem:[#allocation2 + $0x1f0] sm:$0xff]  ;;  %v341_v32 = vld [vmem:[#allocation2 + $0x178] sm:$0xff] }
  0xd9   :  { %2480 = vmatprep.subr.bf16.mxu0 %v3817_v33  ;;  %2533 = vmatprep.subr.bf16.mxu1 %v3819_v34  ;;  %v357_v33 = vld [vmem:[#allocation2 + $0x1f8] sm:$0xff]  ;;  %v3788_v34 = vcombine.low %v308_v21, %v324_v22  ;;  %v3821_v36 = vcombine.high %v340_v30, %v356_v31 }
  0xda   :  { %2414 = vmatprep.mubr.bf16.mxu0 %v4081_v0  ;;  %2467 = vmatprep.mubr.bf16.mxu1 %v4081_v0  ;;  %v3823_v38 = vcombine.high %v341_v32, %v357_v33  ;;  %v3822_v44 = vcombine.low %v341_v32, %v357_v33 }
  0xdc   :  { %2481 = vmatpush1.bf16.msra.mxu0 %v3816_v40  ;;  %2534 = vmatpush1.bf16.msra.mxu1 %v3818_v41  ;;  %v388_v40 = vld [vmem:[#allocation2 + $0x2f0] sm:$0xff]  ;;  %v373_v41 = vld [vmem:[#allocation2 + $0x278] sm:$0xff] }
  0xdd   :  { %2482 = vmatprep.subr.bf16.mxu0 %v3849_v42  ;;  %2535 = vmatprep.subr.bf16.mxu1 %v3851_v43  ;;  %v389_v42 = vld [vmem:[#allocation2 + $0x2f8] sm:$0xff]  ;;  %v3820_v43 = vcombine.low %v340_v30, %v356_v31  ;;  %v3853_v45 = vcombine.high %v372_v39, %v388_v40 }
  0xde   :  { %v3855_v46 = vcombine.high %v373_v41, %v389_v42  ;;  %v3854_v51 = vcombine.low %v373_v41, %v389_v42  ;;  %v4224_v41 = vpop.permute.xlu1 %3093 }
  0xdf   :  { %2415 = vmatmul.mubr.bf16.gmra.mrb[44].mxu0 %v4195_v55  ;;  %2468 = vmatmul.mubr.bf16.gmra.mrb[44].mxu1 %v4195_v55 }
  0xe0   :  { %2483 = vmatpush1.bf16.msra.mxu0 %v3848_v47  ;;  %2536 = vmatpush1.bf16.msra.mxu1 %v3850_v48  ;;  %v420_v47 = vld [vmem:[#allocation2 + $0x3f0] sm:$0xff]  ;;  %v405_v48 = vld [vmem:[#allocation2 + $0x378] sm:$0xff] }
  0xe1   :  { %2484 = vmatprep.subr.bf16.mxu0 %v3881_v49  ;;  %2537 = vmatprep.subr.bf16.mxu1 %v3883_v50  ;;  %v421_v49 = vld [vmem:[#allocation2 + $0x3f8] sm:$0xff]  ;;  %v3852_v50 = vcombine.low %v372_v39, %v388_v40  ;;  %v3885_v52 = vcombine.high %v404_v10, %v420_v47 }
  0xe2   :  { %2510 = vmatprep.mubr.bf16.mxu0 %v4081_v0  ;;  %2563 = vmatprep.mubr.bf16.mxu1 %v4081_v0  ;;  %v3887_v53 = vcombine.high %v405_v48, %v421_v49  ;;  %v3886_v60 = vcombine.low %v405_v48, %v421_v49 }
  0xe4   :  { %2485 = vmatpush1.bf16.msra.mxu0 %v3880_v56  ;;  %2538 = vmatpush1.bf16.msra.mxu1 %v3882_v57  ;;  %v452_v56 = vld [vmem:[#allocation2 + $0x4f0] sm:$0xff]  ;;  %v437_v57 = vld [vmem:[#allocation2 + $0x478] sm:$0xff] }
  0xe5   :  { %2486 = vmatprep.subr.bf16.mxu0 %v3913_v58  ;;  %2539 = vmatprep.subr.bf16.mxu1 %v3915_v59  ;;  %v453_v58 = vld [vmem:[#allocation2 + $0x4f8] sm:$0xff]  ;;  %v3884_v59 = vcombine.low %v404_v10, %v420_v47  ;;  %v3917_v61 = vcombine.high %v436_v54, %v452_v56 }
  0xe6   :  { %v3919_v62 = vcombine.high %v437_v57, %v453_v58  ;;  %v3918_v5 = vcombine.low %v437_v57, %v453_v58 }
  0xe8   :  { %2487 = vmatpush1.bf16.msra.mxu0 %v3912_v63  ;;  %2540 = vmatpush1.bf16.msra.mxu1 %v3914_v1  ;;  %v484_v63 = vld [vmem:[#allocation2 + $0x5f0] sm:$0xff]  ;;  %v469_v1 = vld [vmem:[#allocation2 + $0x578] sm:$0xff] }
  0xe9   :  { %2488 = vmatprep.subr.bf16.mxu0 %v3945_v2  ;;  %2541 = vmatprep.subr.bf16.mxu1 %v3947_v3  ;;  %v485_v2 = vld [vmem:[#allocation2 + $0x5f8] sm:$0xff]  ;;  %v3916_v3 = vcombine.low %v436_v54, %v452_v56  ;;  %v3949_v6 = vcombine.high %v468_v29, %v484_v63  ;;  %v3948_v13 = vcombine.low %v468_v29, %v484_v63 }
  0xea   :  { %v3951_v7 = vcombine.high %v469_v1, %v485_v2  ;;  %v3950_v16 = vcombine.low %v469_v1, %v485_v2 }
  0xec   :  { %2489 = vmatpush1.bf16.msra.mxu0 %v3944_v8  ;;  %2542 = vmatpush1.bf16.msra.mxu1 %v3946_v9  ;;  %v500_v8 = vld [vmem:[#allocation2 + $0x670] sm:$0xff] }
  0xed   :  { %2490 = vmatprep.subr.bf16.mxu0 %v3977_v11  ;;  %2543 = vmatprep.subr.bf16.mxu1 %v3979_v12  ;;  %v516_v9 = vld [vmem:[#allocation2 + $0x6f0] sm:$0xff]  ;;  %v501_v11 = vld [vmem:[#allocation2 + $0x678] sm:$0xff] }
  0xee   :  { %v517_v12 = vld [vmem:[#allocation2 + $0x6f8] sm:$0xff]  ;;  %v3980_v21 = vcombine.low %v500_v8, %v516_v9 }
  0xef   :  { %v3983_v22 = vcombine.high %v501_v11, %v517_v12 }
  0xf0   :  { %2491 = vmatpush1.bf16.msra.mxu0 %v3976_v17  ;;  %2544 = vmatpush1.bf16.msra.mxu1 %v3978_v18  ;;  %v3981_v17 = vcombine.high %v500_v8, %v516_v9  ;;  %v4213_v18 = vld [vmem:[#allocation2 + $0x778] sm:$0xff] }
  0xf1   :  { %2492 = vmatprep.subr.bf16.mxu0 %v4009_v19  ;;  %2545 = vmatprep.subr.bf16.mxu1 %v4011_v20  ;;  %v549_v19 = vld [vmem:[#allocation2 + $0x7f8] sm:$0xff] }
  0xf2   :  { %v4014_v32 = vcombine.low %v4213_v18, %v549_v19  ;;  %v4015_v33 = vcombine.high %v4213_v18, %v549_v19 }
  0xf4   :  { %2493 = vmatpush1.bf16.msra.mxu0 %v4008_v25  ;;  %2546 = vmatpush1.bf16.msra.mxu1 %v4010_v26  ;;  %v3982_v26 = vcombine.low %v501_v11, %v517_v12 }
  0xf5   :  { %2584 = vmatprep.subr.bf16.mxu0 %v3789_v27  ;;  %2637 = vmatprep.subr.bf16.mxu1 %v3791_v28  ;;  %v4012_v27 = vcombine.low %v4211_v14, %v548_v15  ;;  %v4013_v28 = vcombine.high %v4211_v14, %v548_v15 }
  0xf7   :  { %2511 = vmatmul.mubr.bf16.vlgmr.msra.gmra.mrb[48].mxu0 %v4186_v37  ;;  %2564 = vmatmul.mubr.bf16.vlgmr.msra.gmra.mrb[48].mxu1 %v4186_v37 }
  0xf8   :  { %2585 = vmatpush1.bf16.msra.mxu0 %v3788_v34  ;;  %2638 = vmatpush1.bf16.msra.mxu1 %v3790_v35 }
  0xf9   :  { %2586 = vmatprep.subr.bf16.mxu0 %v3821_v36  ;;  %2639 = vmatprep.subr.bf16.mxu1 %v3823_v38 }
  0xfa   :  { %2520 = vmatprep.mubr.bf16.mxu0 %v4081_v0  ;;  %2573 = vmatprep.mubr.bf16.mxu1 %v4081_v0 }
  0xfc   :  { %2587 = vmatpush1.bf16.msra.mxu0 %v3820_v43  ;;  %2640 = vmatpush1.bf16.msra.mxu1 %v3822_v44 }
  0xfd   :  { %2588 = vmatprep.subr.bf16.mxu0 %v3853_v45  ;;  %2641 = vmatprep.subr.bf16.mxu1 %v3855_v46 }
  0xff   :  { %2521 = vmatmul.mubr.bf16.gmra.mrb[52].mxu0 %v4195_v55  ;;  %2574 = vmatmul.mubr.bf16.gmra.mrb[52].mxu1 %v4195_v55 }
 0x100   :  { %2589 = vmatpush1.bf16.msra.mxu0 %v3852_v50  ;;  %2642 = vmatpush1.bf16.msra.mxu1 %v3854_v51 }
 0x101   :  { %2590 = vmatprep.subr.bf16.mxu0 %v3885_v52  ;;  %2643 = vmatprep.subr.bf16.mxu1 %v3887_v53 }
 0x102   :  { %2616 = vmatprep.mubr.bf16.mxu0 %v4081_v0  ;;  %2669 = vmatprep.mubr.bf16.mxu1 %v4081_v0 }
 0x104   :  { %2591 = vmatpush1.bf16.msra.mxu0 %v3884_v59  ;;  %2644 = vmatpush1.bf16.msra.mxu1 %v3886_v60 }
 0x105   :  { %2592 = vmatprep.subr.bf16.mxu0 %v3917_v61  ;;  %2645 = vmatprep.subr.bf16.mxu1 %v3919_v62  ;;  %v4231_v61 = vpop.permute.xlu1 %3098 }
 0x108   :  { %2593 = vmatpush1.bf16.msra.mxu0 %v3916_v3  ;;  %2646 = vmatpush1.bf16.msra.mxu1 %v3918_v5 }
 0x109   :  { %2594 = vmatprep.subr.bf16.mxu0 %v3949_v6  ;;  %2647 = vmatprep.subr.bf16.mxu1 %v3951_v7 }
 0x10a   :  { %v1876_v20 = vpop.f32.mrb[0].mxu0  ;;  %v1929_v24 = vpop.f32.mrb[0].mxu1 }
 0x10b   :  { %v1878_v25 = vpop.f32.mrb[1].mxu0  ;;  %v1931_v30 = vpop.f32.mrb[1].mxu1  ;;  %v3101_v36 = vadd.f32 %v4209_v4, %v1876_v20  ;;  %v3103_v40 = vadd.f32 %v4209_v4, %v1929_v24 }
 0x10c   :  { %v1880_v31 = vpop.f32.mrb[2].mxu0  ;;  %2595 = vmatpush1.bf16.msra.mxu0 %v3948_v13  ;;  %v1933_v34 = vpop.f32.mrb[2].mxu1  ;;  %2648 = vmatpush1.bf16.msra.mxu1 %v3950_v16  ;;  %v3102_v39 = vadd.f32 %v4209_v4, %v1878_v25  ;;  %v3104_v42 = vadd.f32 %v4209_v4, %v1931_v30 }
 0x10d   :  { %v1882_v35 = vpop.f32.mrb[3].mxu0  ;;  %2596 = vmatprep.subr.bf16.mxu0 %v3981_v17  ;;  %v1935_v38 = vpop.f32.mrb[3].mxu1  ;;  %2649 = vmatprep.subr.bf16.mxu1 %v3983_v22  ;;  %vm3229_vm0 = vcmp.gt.f32.partialorder %v3101_v36, 0.0  ;;  %v3357_v43 = vmul.f32 0.2, %v3101_v36  ;;  %vm3231_vm2 = vcmp.gt.f32.partialorder %v3103_v40, 0.0  ;;  %v3133_v47 = vadd.f32 %v4215_v23, %v1880_v31 }
 0x10e   :  { %vm3230_vm1 = vcmp.gt.f32.partialorder %v3102_v39, 0.0  ;;  %v3358_v44 = vmul.f32 0.2, %v3102_v39  ;;  %v3359_v45 = vmul.f32 0.2, %v3103_v40  ;;  %vm3232_vm3 = vcmp.gt.f32.partialorder %v3104_v42, 0.0 }
 0x10f   :  { %v3360_v46 = vmul.f32 0.2, %v3104_v42  ;;  %v3485_v10 = vsel %vm3229_vm0, %v3101_v36, %v3357_v43  ;;  %v3134_v50 = vadd.f32 %v4215_v23, %v1882_v35  ;;  %v3135_v51 = vadd.f32 %v4215_v23, %v1933_v34 }
 0x110   :  { %2597 = vmatpush1.bf16.msra.mxu0 %v3980_v21  ;;  %2650 = vmatpush1.bf16.msra.mxu1 %v3982_v26  ;;  %v3486_v48 = vsel %vm3230_vm1, %v3102_v39, %v3358_v44  ;;  %v3487_v49 = vsel %vm3231_vm2, %v3103_v40, %v3359_v45  ;;  %3613 = vst [vmem:[#allocation5] sm:$0xff] %v3485_v10  ;;  %vm3261_vm4 = vcmp.gt.f32.partialorder %v3133_v47, 0.0  ;;  %v3389_v56 = vmul.f32 0.2, %v3133_v47 }
 0x111   :  { %2598 = vmatprep.subr.bf16.mxu0 %v4013_v28  ;;  %2651 = vmatprep.subr.bf16.mxu1 %v4015_v33  ;;  %v3488_v53 = vsel %vm3232_vm3, %v3104_v42, %v3360_v46  ;;  %3614 = vst [vmem:[#allocation5 + $0x8] sm:$0xff] %v3486_v48  ;;  %3615 = vst [vmem:[#allocation5 + $0x10] sm:$0xff] %v3487_v49  ;;  %v3136_v54 = vadd.f32 %v4215_v23, %v1935_v38  ;;  %vm3262_vm5 = vcmp.gt.f32.partialorder %v3134_v50, 0.0 }
 0x112   :  { %v1886_v52 = vpop.f32.mrb[4].mxu0  ;;  %v1939_v57 = vpop.f32.mrb[4].mxu1  ;;  %3616 = vst [vmem:[#allocation5 + $0x18] sm:$0xff] %v3488_v53  ;;  %vm3263_vm6 = vcmp.gt.f32.partialorder %v3135_v51, 0.0  ;;  %v3390_v59 = vmul.f32 0.2, %v3134_v50  ;;  %v3517_v29 = vsel %vm3261_vm4, %v3133_v47, %v3389_v56 }
 0x113   :  { %v1888_v58 = vpop.f32.mrb[5].mxu0  ;;  %v3391_v60 = vmul.f32 0.2, %v3135_v51  ;;  %vm3264_vm7 = vcmp.gt.f32.partialorder %v3136_v54, 0.0  ;;  %v3392_v62 = vmul.f32 0.2, %v3136_v54  ;;  %v3165_v9 = vadd.f32 %v4224_v41, %v1886_v52 }
 0x114   :  { %2599 = vmatpush1.bf16.msra.mxu0 %v4012_v27  ;;  %2652 = vmatpush1.bf16.msra.mxu1 %v4014_v32  ;;  %v1941_v63 = vpop.f32.mrb[5].mxu1  ;;  %v1890_v1 = vpop.f32.mrb[6].mxu0  ;;  %v3518_v2 = vsel %vm3262_vm5, %v3134_v50, %v3390_v59  ;;  %3645 = vst [vmem:[#allocation5 + $0x100] sm:$0xff] %v3517_v29  ;;  %v3166_v11 = vadd.f32 %v4224_v41, %v1888_v58 }
 0x115   :  { %v3519_v3 = vsel %vm3263_vm6, %v3135_v51, %v3391_v60  ;;  %v1943_v5 = vpop.f32.mrb[6].mxu1  ;;  %v1892_v6 = vpop.f32.mrb[7].mxu0  ;;  %v3520_v7 = vsel %vm3264_vm7, %v3136_v54, %v3392_v62  ;;  %3646 = vst [vmem:[#allocation5 + $0x108] sm:$0xff] %v3518_v2  ;;  %v3167_v12 = vadd.f32 %v4224_v41, %v1939_v57  ;;  %v3168_v13 = vadd.f32 %v4224_v41, %v1941_v63 }
 0x116   :  { %3647 = vst [vmem:[#allocation5 + $0x110] sm:$0xff] %v3519_v3  ;;  %v1945_v8 = vpop.f32.mrb[7].mxu1  ;;  %3648 = vst [vmem:[#allocation5 + $0x118] sm:$0xff] %v3520_v7  ;;  %v3197_v14 = vadd.f32 %v4231_v61, %v1890_v1  ;;  %vm3293_vm8 = vcmp.gt.f32.partialorder %v3165_v9, 0.0  ;;  %v3421_v15 = vmul.f32 0.2, %v3165_v9  ;;  %v3198_v16 = vadd.f32 %v4231_v61, %v1892_v6 }
 0x117   :  { %2617 = vmatmul.mubr.bf16.vlgmr.msra.gmra.mrb[56].mxu0 %v4186_v37  ;;  %2670 = vmatmul.mubr.bf16.vlgmr.msra.gmra.mrb[56].mxu1 %v4186_v37  ;;  %v3199_v37 = vadd.f32 %v4231_v61, %v1943_v5  ;;  %vm3294_vm9 = vcmp.gt.f32.partialorder %v3166_v11, 0.0  ;;  %vm3295_vm10 = vcmp.gt.f32.partialorder %v3167_v12, 0.0  ;;  %vm3296_vm11 = vcmp.gt.f32.partialorder %v3168_v13, 0.0 }
 0x118   :  { %2626 = vmatprep.mubr.bf16.mxu0 %v4081_v0  ;;  %2679 = vmatprep.mubr.bf16.mxu1 %v4081_v0  ;;  %v3422_v17 = vmul.f32 0.2, %v3166_v11  ;;  %v3423_v18 = vmul.f32 0.2, %v3167_v12  ;;  %v3424_v0 = vmul.f32 0.2, %v3168_v13  ;;  %v3549_v19 = vsel %vm3293_vm8, %v3165_v9, %v3421_v15 }
 0x119   :  { %v3200_v20 = vadd.f32 %v4231_v61, %v1945_v8  ;;  %3677 = vst [vmem:[#allocation5 + $0x200] sm:$0xff] %v3549_v19  ;;  %vm3325_vm12 = vcmp.gt.f32.partialorder %v3197_v14, 0.0  ;;  %vm3326_vm13 = vcmp.gt.f32.partialorder %v3198_v16, 0.0  ;;  %vm3327_vm14 = vcmp.gt.f32.partialorder %v3199_v37, 0.0 }
 0x11a   :  { %v3550_v21 = vsel %vm3294_vm9, %v3166_v11, %v3422_v17  ;;  %v3551_v22 = vsel %vm3295_vm10, %v3167_v12, %v3423_v18  ;;  %v3552_v24 = vsel %vm3296_vm11, %v3168_v13, %v3424_v0  ;;  %v3453_v25 = vmul.f32 0.2, %v3197_v14 }
 0x11b   :  { %3678 = vst [vmem:[#allocation5 + $0x208] sm:$0xff] %v3550_v21  ;;  %vm3328_vm15 = vcmp.gt.f32.partialorder %v3200_v20, 0.0  ;;  %3679 = vst [vmem:[#allocation5 + $0x210] sm:$0xff] %v3551_v22  ;;  %v3454_v26 = vmul.f32 0.2, %v3198_v16 }
 0x11c   :  { %3680 = vst [vmem:[#allocation5 + $0x218] sm:$0xff] %v3552_v24  ;;  %v3455_v27 = vmul.f32 0.2, %v3199_v37  ;;  %v3456_v28 = vmul.f32 0.2, %v3200_v20  ;;  %v3581_v30 = vsel %vm3325_vm12, %v3197_v14, %v3453_v25 }
 0x11d   :  { %v3582_v31 = vsel %vm3326_vm13, %v3198_v16, %v3454_v26  ;;  %3709 = vst [vmem:[#allocation5 + $0x300] sm:$0xff] %v3581_v30 }
 0x11e   :  { %v3583_v32 = vsel %vm3327_vm14, %v3199_v37, %v3455_v27  ;;  %v3584_v33 = vsel %vm3328_vm15, %v3200_v20, %v3456_v28  ;;  %3710 = vst [vmem:[#allocation5 + $0x308] sm:$0xff] %v3582_v31 }
 0x11f   :  { %2627 = vmatmul.mubr.bf16.gmra.mrb[60].mxu0 %v4195_v55  ;;  %2680 = vmatmul.mubr.bf16.gmra.mrb[60].mxu1 %v4195_v55  ;;  %3711 = vst [vmem:[#allocation5 + $0x310] sm:$0xff] %v3583_v32  ;;  %3712 = vst [vmem:[#allocation5 + $0x318] sm:$0xff] %v3584_v33 }
 0x12a   :  { %v1982_v34 = vpop.f32.mrb[8].mxu0  ;;  %v2035_v35 = vpop.f32.mrb[8].mxu1 }
 0x12b   :  { %v1984_v36 = vpop.f32.mrb[9].mxu0  ;;  %v2037_v38 = vpop.f32.mrb[9].mxu1  ;;  %v3105_v40 = vadd.f32 %v4209_v4, %v1982_v34  ;;  %v3107_v44 = vadd.f32 %v4209_v4, %v2035_v35 }
 0x12c   :  { %v1986_v39 = vpop.f32.mrb[10].mxu0  ;;  %v2039_v42 = vpop.f32.mrb[10].mxu1  ;;  %v3106_v55 = vadd.f32 %v4209_v4, %v1984_v36  ;;  %v3108_v10 = vadd.f32 %v4209_v4, %v2037_v38 }
 0x12d   :  { %v1988_v43 = vpop.f32.mrb[11].mxu0  ;;  %v2041_v45 = vpop.f32.mrb[11].mxu1  ;;  %vm3233_vm0 = vcmp.gt.f32.partialorder %v3105_v40, 0.0  ;;  %v3361_v46 = vmul.f32 0.2, %v3105_v40  ;;  %v3137_v47 = vadd.f32 %v4215_v23, %v1986_v39  ;;  %vm3235_vm1 = vcmp.gt.f32.partialorder %v3107_v44, 0.0 }
 0x12e   :  { %v3363_v48 = vmul.f32 0.2, %v3107_v44  ;;  %vm3234_vm2 = vcmp.gt.f32.partialorder %v3106_v55, 0.0  ;;  %v3362_v49 = vmul.f32 0.2, %v3106_v55  ;;  %vm3236_vm3 = vcmp.gt.f32.partialorder %v3108_v10, 0.0 }
 0x12f   :  { %v3489_v50 = vsel %vm3233_vm0, %v3105_v40, %v3361_v46  ;;  %v3364_v51 = vmul.f32 0.2, %v3108_v10  ;;  %vm3265_vm4 = vcmp.gt.f32.partialorder %v3137_v47, 0.0  ;;  %v3393_v54 = vmul.f32 0.2, %v3137_v47 }
 0x130   :  { %3617 = vst [vmem:[#allocation5 + $0x20] sm:$0xff] %v3489_v50  ;;  %v3491_v52 = vsel %vm3235_vm1, %v3107_v44, %v3363_v48  ;;  %v3490_v53 = vsel %vm3234_vm2, %v3106_v55, %v3362_v49  ;;  %v3139_v56 = vadd.f32 %v4215_v23, %v2039_v42  ;;  %v3138_v59 = vadd.f32 %v4215_v23, %v1988_v43 }
 0x131   :  { %3619 = vst [vmem:[#allocation5 + $0x30] sm:$0xff] %v3491_v52  ;;  %3618 = vst [vmem:[#allocation5 + $0x28] sm:$0xff] %v3490_v53  ;;  %v3492_v58 = vsel %vm3236_vm3, %v3108_v10, %v3364_v51  ;;  %v3521_v29 = vsel %vm3265_vm4, %v3137_v47, %v3393_v54  ;;  %v3140_v5 = vadd.f32 %v4215_v23, %v2041_v45 }
 0x132   :  { %v1992_v57 = vpop.f32.mrb[12].mxu0  ;;  %v2045_v60 = vpop.f32.mrb[12].mxu1  ;;  %3620 = vst [vmem:[#allocation5 + $0x38] sm:$0xff] %v3492_v58  ;;  %vm3267_vm5 = vcmp.gt.f32.partialorder %v3139_v56, 0.0  ;;  %v3395_v63 = vmul.f32 0.2, %v3139_v56 }
 0x133   :  { %v1994_v62 = vpop.f32.mrb[13].mxu0  ;;  %v2047_v1 = vpop.f32.mrb[13].mxu1  ;;  %3649 = vst [vmem:[#allocation5 + $0x120] sm:$0xff] %v3521_v29  ;;  %vm3266_vm6 = vcmp.gt.f32.partialorder %v3138_v59, 0.0  ;;  %v3394_v3 = vmul.f32 0.2, %v3138_v59  ;;  %v3169_v6 = vadd.f32 %v4224_v41, %v1992_v57  ;;  %v3171_v11 = vadd.f32 %v4224_v41, %v2045_v60 }
 0x134   :  { %v1996_v2 = vpop.f32.mrb[14].mxu0  ;;  %v2049_v7 = vpop.f32.mrb[14].mxu1  ;;  %v3523_v9 = vsel %vm3267_vm5, %v3139_v56, %v3395_v63  ;;  %vm3268_vm7 = vcmp.gt.f32.partialorder %v3140_v5, 0.0  ;;  %v3396_v14 = vmul.f32 0.2, %v3140_v5  ;;  %v3170_v37 = vadd.f32 %v4224_v41, %v1994_v62 }
 0x135   :  { %v1998_v8 = vpop.f32.mrb[15].mxu0  ;;  %v2051_v12 = vpop.f32.mrb[15].mxu1  ;;  %3651 = vst [vmem:[#allocation5 + $0x130] sm:$0xff] %v3523_v9  ;;  %v3522_v13 = vsel %vm3266_vm6, %v3138_v59, %v3394_v3  ;;  %vm3297_vm8 = vcmp.gt.f32.partialorder %v3169_v6, 0.0  ;;  %v3425_v15 = vmul.f32 0.2, %v3169_v6  ;;  %v3172_v18 = vadd.f32 %v4224_v41, %v2047_v1 }
 0x136   :  { %3650 = vst [vmem:[#allocation5 + $0x128] sm:$0xff] %v3522_v13  ;;  %vm3299_vm9 = vcmp.gt.f32.partialorder %v3171_v11, 0.0  ;;  %v3427_v16 = vmul.f32 0.2, %v3171_v11  ;;  %v3524_v17 = vsel %vm3268_vm7, %v3140_v5, %v3396_v14  ;;  %vm3298_vm10 = vcmp.gt.f32.partialorder %v3170_v37, 0.0 }
 0x137   :  { %3652 = vst [vmem:[#allocation5 + $0x138] sm:$0xff] %v3524_v17  ;;  %v3553_v0 = vsel %vm3297_vm8, %v3169_v6, %v3425_v15  ;;  %v3426_v20 = vmul.f32 0.2, %v3170_v37  ;;  %vm3300_vm11 = vcmp.gt.f32.partialorder %v3172_v18, 0.0  ;;  %v3428_v21 = vmul.f32 0.2, %v3172_v18 }
 0x138   :  { %v3555_v19 = vsel %vm3299_vm9, %v3171_v11, %v3427_v16  ;;  %3681 = vst [vmem:[#allocation5 + $0x220] sm:$0xff] %v3553_v0  ;;  %v3201_v22 = vadd.f32 %v4231_v61, %v1996_v2  ;;  %v3203_v24 = vadd.f32 %v4231_v61, %v2049_v7  ;;  %v3202_v30 = vadd.f32 %v4231_v61, %v1998_v8 }
 0x139   :  { %3683 = vst [vmem:[#allocation5 + $0x230] sm:$0xff] %v3555_v19  ;;  %v3554_v25 = vsel %vm3298_vm10, %v3170_v37, %v3426_v20  ;;  %v3556_v26 = vsel %vm3300_vm11, %v3172_v18, %v3428_v21  ;;  %v3204_v31 = vadd.f32 %v4231_v61, %v2051_v12 }
 0x13a   :  { %3682 = vst [vmem:[#allocation5 + $0x228] sm:$0xff] %v3554_v25  ;;  %vm3329_vm12 = vcmp.gt.f32.partialorder %v3201_v22, 0.0  ;;  %v3457_v27 = vmul.f32 0.2, %v3201_v22  ;;  %vm3331_vm13 = vcmp.gt.f32.partialorder %v3203_v24, 0.0  ;;  %3684 = vst [vmem:[#allocation5 + $0x238] sm:$0xff] %v3556_v26 }
 0x13b   :  { %v3459_v28 = vmul.f32 0.2, %v3203_v24  ;;  %vm3330_vm14 = vcmp.gt.f32.partialorder %v3202_v30, 0.0  ;;  %v3458_v34 = vmul.f32 0.2, %v3202_v30  ;;  %vm3332_vm15 = vcmp.gt.f32.partialorder %v3204_v31, 0.0 }
 0x13c   :  { %v3585_v32 = vsel %vm3329_vm12, %v3201_v22, %v3457_v27  ;;  %v3460_v35 = vmul.f32 0.2, %v3204_v31 }
 0x13d   :  { %3713 = vst [vmem:[#allocation5 + $0x320] sm:$0xff] %v3585_v32  ;;  %v3587_v33 = vsel %vm3331_vm13, %v3203_v24, %v3459_v28  ;;  %v3586_v36 = vsel %vm3330_vm14, %v3202_v30, %v3458_v34 }
 0x13e   :  { %3715 = vst [vmem:[#allocation5 + $0x330] sm:$0xff] %v3587_v33  ;;  %3714 = vst [vmem:[#allocation5 + $0x328] sm:$0xff] %v3586_v36  ;;  %v3588_v38 = vsel %vm3332_vm15, %v3204_v31, %v3460_v35 }
 0x13f   :  { %3716 = vst [vmem:[#allocation5 + $0x338] sm:$0xff] %v3588_v38 }
 0x14a   :  { %v2088_v39 = vpop.f32.mrb[16].mxu0  ;;  %v2141_v40 = vpop.f32.mrb[16].mxu1 }
 0x14b   :  { %v2090_v42 = vpop.f32.mrb[17].mxu0  ;;  %v2143_v43 = vpop.f32.mrb[17].mxu1  ;;  %v3109_v55 = vadd.f32 %v4209_v4, %v2088_v39  ;;  %v3111_v10 = vadd.f32 %v4209_v4, %v2141_v40 }
 0x14c   :  { %v2092_v44 = vpop.f32.mrb[18].mxu0  ;;  %v2145_v45 = vpop.f32.mrb[18].mxu1  ;;  %v3110_v47 = vadd.f32 %v4209_v4, %v2090_v42  ;;  %v3112_v50 = vadd.f32 %v4209_v4, %v2143_v43 }
 0x14d   :  { %v2094_v46 = vpop.f32.mrb[19].mxu0  ;;  %v2147_v48 = vpop.f32.mrb[19].mxu1  ;;  %vm3237_vm0 = vcmp.gt.f32.partialorder %v3109_v55, 0.0  ;;  %v3365_v49 = vmul.f32 0.2, %v3109_v55  ;;  %v3141_v51 = vadd.f32 %v4215_v23, %v2092_v44  ;;  %vm3239_vm1 = vcmp.gt.f32.partialorder %v3111_v10, 0.0 }
 0x14e   :  { %v3367_v52 = vmul.f32 0.2, %v3111_v10  ;;  %vm3238_vm2 = vcmp.gt.f32.partialorder %v3110_v47, 0.0  ;;  %v3366_v53 = vmul.f32 0.2, %v3110_v47  ;;  %vm3240_vm3 = vcmp.gt.f32.partialorder %v3112_v50, 0.0 }
 0x14f   :  { %v3493_v54 = vsel %vm3237_vm0, %v3109_v55, %v3365_v49  ;;  %v3368_v56 = vmul.f32 0.2, %v3112_v50  ;;  %vm3269_vm4 = vcmp.gt.f32.partialorder %v3141_v51, 0.0  ;;  %v3397_v59 = vmul.f32 0.2, %v3141_v51 }
 0x150   :  { %3621 = vst [vmem:[#allocation5 + $0x40] sm:$0xff] %v3493_v54  ;;  %v3495_v57 = vsel %vm3239_vm1, %v3111_v10, %v3367_v52  ;;  %v3494_v58 = vsel %vm3238_vm2, %v3110_v47, %v3366_v53  ;;  %v3143_v60 = vadd.f32 %v4215_v23, %v2145_v45  ;;  %v3142_v63 = vadd.f32 %v4215_v23, %v2094_v46 }
 0x151   :  { %3623 = vst [vmem:[#allocation5 + $0x50] sm:$0xff] %v3495_v57  ;;  %3622 = vst [vmem:[#allocation5 + $0x48] sm:$0xff] %v3494_v58  ;;  %v3496_v29 = vsel %vm3240_vm3, %v3112_v50, %v3368_v56  ;;  %v3525_v3 = vsel %vm3269_vm4, %v3141_v51, %v3397_v59  ;;  %v3144_v9 = vadd.f32 %v4215_v23, %v2147_v48 }
 0x152   :  { %v2098_v62 = vpop.f32.mrb[20].mxu0  ;;  %v2151_v1 = vpop.f32.mrb[20].mxu1  ;;  %3624 = vst [vmem:[#allocation5 + $0x58] sm:$0xff] %v3496_v29  ;;  %vm3271_vm5 = vcmp.gt.f32.partialorder %v3143_v60, 0.0  ;;  %v3399_v5 = vmul.f32 0.2, %v3143_v60 }
 0x153   :  { %v2100_v2 = vpop.f32.mrb[21].mxu0  ;;  %v2153_v6 = vpop.f32.mrb[21].mxu1  ;;  %3653 = vst [vmem:[#allocation5 + $0x140] sm:$0xff] %v3525_v3  ;;  %vm3270_vm6 = vcmp.gt.f32.partialorder %v3142_v63, 0.0  ;;  %v3398_v8 = vmul.f32 0.2, %v3142_v63  ;;  %v3173_v11 = vadd.f32 %v4224_v41, %v2098_v62  ;;  %v3175_v15 = vadd.f32 %v4224_v41, %v2151_v1 }
 0x154   :  { %v2102_v7 = vpop.f32.mrb[22].mxu0  ;;  %v2155_v12 = vpop.f32.mrb[22].mxu1  ;;  %v3527_v14 = vsel %vm3271_vm5, %v3143_v60, %v3399_v5  ;;  %vm3272_vm7 = vcmp.gt.f32.partialorder %v3144_v9, 0.0  ;;  %v3400_v17 = vmul.f32 0.2, %v3144_v9  ;;  %v3174_v19 = vadd.f32 %v4224_v41, %v2100_v2 }
 0x155   :  { %v2104_v13 = vpop.f32.mrb[23].mxu0  ;;  %v2157_v16 = vpop.f32.mrb[23].mxu1  ;;  %3655 = vst [vmem:[#allocation5 + $0x150] sm:$0xff] %v3527_v14  ;;  %v3526_v37 = vsel %vm3270_vm6, %v3142_v63, %v3398_v8  ;;  %vm3301_vm8 = vcmp.gt.f32.partialorder %v3173_v11, 0.0  ;;  %v3429_v18 = vmul.f32 0.2, %v3173_v11  ;;  %v3176_v21 = vadd.f32 %v4224_v41, %v2153_v6 }
 0x156   :  { %3654 = vst [vmem:[#allocation5 + $0x148] sm:$0xff] %v3526_v37  ;;  %vm3303_vm9 = vcmp.gt.f32.partialorder %v3175_v15, 0.0  ;;  %v3431_v0 = vmul.f32 0.2, %v3175_v15  ;;  %v3528_v20 = vsel %vm3272_vm7, %v3144_v9, %v3400_v17  ;;  %vm3302_vm10 = vcmp.gt.f32.partialorder %v3174_v19, 0.0 }
 0x157   :  { %3656 = vst [vmem:[#allocation5 + $0x158] sm:$0xff] %v3528_v20  ;;  %v3557_v22 = vsel %vm3301_vm8, %v3173_v11, %v3429_v18  ;;  %v3430_v25 = vmul.f32 0.2, %v3174_v19  ;;  %vm3304_vm11 = vcmp.gt.f32.partialorder %v3176_v21, 0.0  ;;  %v3432_v26 = vmul.f32 0.2, %v3176_v21 }
 0x158   :  { %v3559_v24 = vsel %vm3303_vm9, %v3175_v15, %v3431_v0  ;;  %3685 = vst [vmem:[#allocation5 + $0x240] sm:$0xff] %v3557_v22  ;;  %v3205_v27 = vadd.f32 %v4231_v61, %v2102_v7  ;;  %v3207_v28 = vadd.f32 %v4231_v61, %v2155_v12  ;;  %v3206_v34 = vadd.f32 %v4231_v61, %v2104_v13 }
 0x159   :  { %3687 = vst [vmem:[#allocation5 + $0x250] sm:$0xff] %v3559_v24  ;;  %v3558_v30 = vsel %vm3302_vm10, %v3174_v19, %v3430_v25  ;;  %v3560_v31 = vsel %vm3304_vm11, %v3176_v21, %v3432_v26  ;;  %v3208_v35 = vadd.f32 %v4231_v61, %v2157_v16 }
 0x15a   :  { %3686 = vst [vmem:[#allocation5 + $0x248] sm:$0xff] %v3558_v30  ;;  %vm3333_vm12 = vcmp.gt.f32.partialorder %v3205_v27, 0.0  ;;  %v3461_v32 = vmul.f32 0.2, %v3205_v27  ;;  %vm3335_vm13 = vcmp.gt.f32.partialorder %v3207_v28, 0.0  ;;  %3688 = vst [vmem:[#allocation5 + $0x258] sm:$0xff] %v3560_v31 }
 0x15b   :  { %v3463_v33 = vmul.f32 0.2, %v3207_v28  ;;  %vm3334_vm14 = vcmp.gt.f32.partialorder %v3206_v34, 0.0  ;;  %v3462_v39 = vmul.f32 0.2, %v3206_v34  ;;  %vm3336_vm15 = vcmp.gt.f32.partialorder %v3208_v35, 0.0 }
 0x15c   :  { %v3589_v36 = vsel %vm3333_vm12, %v3205_v27, %v3461_v32  ;;  %v3464_v40 = vmul.f32 0.2, %v3208_v35 }
 0x15d   :  { %3717 = vst [vmem:[#allocation5 + $0x340] sm:$0xff] %v3589_v36  ;;  %v3591_v38 = vsel %vm3335_vm13, %v3207_v28, %v3463_v33  ;;  %v3590_v42 = vsel %vm3334_vm14, %v3206_v34, %v3462_v39 }
 0x15e   :  { %3719 = vst [vmem:[#allocation5 + $0x350] sm:$0xff] %v3591_v38  ;;  %3718 = vst [vmem:[#allocation5 + $0x348] sm:$0xff] %v3590_v42  ;;  %v3592_v43 = vsel %vm3336_vm15, %v3208_v35, %v3464_v40 }
 0x15f   :  { %3720 = vst [vmem:[#allocation5 + $0x358] sm:$0xff] %v3592_v43 }
 0x16a   :  { %v2194_v44 = vpop.f32.mrb[24].mxu0  ;;  %v2247_v55 = vpop.f32.mrb[24].mxu1 }
 0x16b   :  { %v2196_v45 = vpop.f32.mrb[25].mxu0  ;;  %v2249_v46 = vpop.f32.mrb[25].mxu1  ;;  %v3113_v47 = vadd.f32 %v4209_v4, %v2194_v44  ;;  %v3115_v50 = vadd.f32 %v4209_v4, %v2247_v55 }
 0x16c   :  { %v2198_v10 = vpop.f32.mrb[26].mxu0  ;;  %v2251_v48 = vpop.f32.mrb[26].mxu1  ;;  %v3114_v51 = vadd.f32 %v4209_v4, %v2196_v45  ;;  %v3116_v54 = vadd.f32 %v4209_v4, %v2249_v46 }
 0x16d   :  { %v2200_v49 = vpop.f32.mrb[27].mxu0  ;;  %v2253_v52 = vpop.f32.mrb[27].mxu1  ;;  %vm3241_vm0 = vcmp.gt.f32.partialorder %v3113_v47, 0.0  ;;  %v3369_v53 = vmul.f32 0.2, %v3113_v47  ;;  %v3145_v56 = vadd.f32 %v4215_v23, %v2198_v10  ;;  %vm3243_vm1 = vcmp.gt.f32.partialorder %v3115_v50, 0.0 }
 0x16e   :  { %v3371_v57 = vmul.f32 0.2, %v3115_v50  ;;  %vm3242_vm2 = vcmp.gt.f32.partialorder %v3114_v51, 0.0  ;;  %v3370_v58 = vmul.f32 0.2, %v3114_v51  ;;  %vm3244_vm3 = vcmp.gt.f32.partialorder %v3116_v54, 0.0 }
 0x16f   :  { %v3497_v59 = vsel %vm3241_vm0, %v3113_v47, %v3369_v53  ;;  %v3372_v60 = vmul.f32 0.2, %v3116_v54  ;;  %vm3273_vm4 = vcmp.gt.f32.partialorder %v3145_v56, 0.0  ;;  %v3401_v63 = vmul.f32 0.2, %v3145_v56 }
 0x170   :  { %3625 = vst [vmem:[#allocation5 + $0x60] sm:$0xff] %v3497_v59  ;;  %v3499_v62 = vsel %vm3243_vm1, %v3115_v50, %v3371_v57  ;;  %v3498_v29 = vsel %vm3242_vm2, %v3114_v51, %v3370_v58  ;;  %v3147_v1 = vadd.f32 %v4215_v23, %v2251_v48  ;;  %v3146_v5 = vadd.f32 %v4215_v23, %v2200_v49 }
 0x171   :  { %3627 = vst [vmem:[#allocation5 + $0x70] sm:$0xff] %v3499_v62  ;;  %3626 = vst [vmem:[#allocation5 + $0x68] sm:$0xff] %v3498_v29  ;;  %v3500_v3 = vsel %vm3244_vm3, %v3116_v54, %v3372_v60  ;;  %v3529_v8 = vsel %vm3273_vm4, %v3145_v56, %v3401_v63  ;;  %v3148_v14 = vadd.f32 %v4215_v23, %v2253_v52 }
 0x172   :  { %v2204_v2 = vpop.f32.mrb[28].mxu0  ;;  %v2257_v6 = vpop.f32.mrb[28].mxu1  ;;  %3628 = vst [vmem:[#allocation5 + $0x78] sm:$0xff] %v3500_v3  ;;  %vm3275_vm5 = vcmp.gt.f32.partialorder %v3147_v1, 0.0  ;;  %v3403_v9 = vmul.f32 0.2, %v3147_v1 }
 0x173   :  { %v2206_v7 = vpop.f32.mrb[29].mxu0  ;;  %v2259_v11 = vpop.f32.mrb[29].mxu1  ;;  %3657 = vst [vmem:[#allocation5 + $0x160] sm:$0xff] %v3529_v8  ;;  %vm3274_vm6 = vcmp.gt.f32.partialorder %v3146_v5, 0.0  ;;  %v3402_v13 = vmul.f32 0.2, %v3146_v5  ;;  %v3177_v15 = vadd.f32 %v4224_v41, %v2204_v2  ;;  %v3179_v18 = vadd.f32 %v4224_v41, %v2257_v6 }
 0x174   :  { %v2208_v12 = vpop.f32.mrb[30].mxu0  ;;  %v2261_v16 = vpop.f32.mrb[30].mxu1  ;;  %v3531_v17 = vsel %vm3275_vm5, %v3147_v1, %v3403_v9  ;;  %vm3276_vm7 = vcmp.gt.f32.partialorder %v3148_v14, 0.0  ;;  %v3404_v20 = vmul.f32 0.2, %v3148_v14  ;;  %v3178_v24 = vadd.f32 %v4224_v41, %v2206_v7 }
 0x175   :  { %v2210_v37 = vpop.f32.mrb[31].mxu0  ;;  %v2263_v0 = vpop.f32.mrb[31].mxu1  ;;  %3659 = vst [vmem:[#allocation5 + $0x170] sm:$0xff] %v3531_v17  ;;  %v3530_v19 = vsel %vm3274_vm6, %v3146_v5, %v3402_v13  ;;  %vm3305_vm8 = vcmp.gt.f32.partialorder %v3177_v15, 0.0  ;;  %v3433_v21 = vmul.f32 0.2, %v3177_v15  ;;  %v3180_v26 = vadd.f32 %v4224_v41, %v2259_v11 }
 0x176   :  { %3658 = vst [vmem:[#allocation5 + $0x168] sm:$0xff] %v3530_v19  ;;  %vm3307_vm9 = vcmp.gt.f32.partialorder %v3179_v18, 0.0  ;;  %v3435_v22 = vmul.f32 0.2, %v3179_v18  ;;  %v3532_v25 = vsel %vm3276_vm7, %v3148_v14, %v3404_v20  ;;  %vm3306_vm10 = vcmp.gt.f32.partialorder %v3178_v24, 0.0 }
 0x177   :  { %3660 = vst [vmem:[#allocation5 + $0x178] sm:$0xff] %v3532_v25  ;;  %v3561_v27 = vsel %vm3305_vm8, %v3177_v15, %v3433_v21  ;;  %v3434_v30 = vmul.f32 0.2, %v3178_v24  ;;  %vm3308_vm11 = vcmp.gt.f32.partialorder %v3180_v26, 0.0  ;;  %v3436_v31 = vmul.f32 0.2, %v3180_v26 }
 0x178   :  { %v3563_v28 = vsel %vm3307_vm9, %v3179_v18, %v3435_v22  ;;  %3689 = vst [vmem:[#allocation5 + $0x260] sm:$0xff] %v3561_v27  ;;  %v3209_v32 = vadd.f32 %v4231_v61, %v2208_v12  ;;  %v3211_v33 = vadd.f32 %v4231_v61, %v2261_v16  ;;  %v3210_v39 = vadd.f32 %v4231_v61, %v2210_v37 }
 0x179   :  { %3691 = vst [vmem:[#allocation5 + $0x270] sm:$0xff] %v3563_v28  ;;  %v3562_v34 = vsel %vm3306_vm10, %v3178_v24, %v3434_v30  ;;  %v3564_v35 = vsel %vm3308_vm11, %v3180_v26, %v3436_v31  ;;  %v3212_v40 = vadd.f32 %v4231_v61, %v2263_v0 }
 0x17a   :  { %3690 = vst [vmem:[#allocation5 + $0x268] sm:$0xff] %v3562_v34  ;;  %vm3337_vm12 = vcmp.gt.f32.partialorder %v3209_v32, 0.0  ;;  %v3465_v36 = vmul.f32 0.2, %v3209_v32  ;;  %vm3339_vm13 = vcmp.gt.f32.partialorder %v3211_v33, 0.0  ;;  %3692 = vst [vmem:[#allocation5 + $0x278] sm:$0xff] %v3564_v35 }
 0x17b   :  { %v3467_v38 = vmul.f32 0.2, %v3211_v33  ;;  %vm3338_vm14 = vcmp.gt.f32.partialorder %v3210_v39, 0.0  ;;  %v3466_v44 = vmul.f32 0.2, %v3210_v39  ;;  %vm3340_vm15 = vcmp.gt.f32.partialorder %v3212_v40, 0.0 }
 0x17c   :  { %v3593_v42 = vsel %vm3337_vm12, %v3209_v32, %v3465_v36  ;;  %v3468_v55 = vmul.f32 0.2, %v3212_v40 }
 0x17d   :  { %3721 = vst [vmem:[#allocation5 + $0x360] sm:$0xff] %v3593_v42  ;;  %v3595_v43 = vsel %vm3339_vm13, %v3211_v33, %v3467_v38  ;;  %v3594_v45 = vsel %vm3338_vm14, %v3210_v39, %v3466_v44 }
 0x17e   :  { %3723 = vst [vmem:[#allocation5 + $0x370] sm:$0xff] %v3595_v43  ;;  %3722 = vst [vmem:[#allocation5 + $0x368] sm:$0xff] %v3594_v45  ;;  %v3596_v46 = vsel %vm3340_vm15, %v3212_v40, %v3468_v55 }
 0x17f   :  { %3724 = vst [vmem:[#allocation5 + $0x378] sm:$0xff] %v3596_v46 }
 0x18a   :  { %v2300_v10 = vpop.f32.mrb[32].mxu0  ;;  %v2353_v47 = vpop.f32.mrb[32].mxu1 }
 0x18b   :  { %v2302_v48 = vpop.f32.mrb[33].mxu0  ;;  %v2355_v49 = vpop.f32.mrb[33].mxu1  ;;  %v3117_v51 = vadd.f32 %v4209_v4, %v2300_v10  ;;  %v3119_v54 = vadd.f32 %v4209_v4, %v2353_v47 }
 0x18c   :  { %v2304_v50 = vpop.f32.mrb[34].mxu0  ;;  %v2357_v52 = vpop.f32.mrb[34].mxu1  ;;  %v3118_v56 = vadd.f32 %v4209_v4, %v2302_v48  ;;  %v3120_v59 = vadd.f32 %v4209_v4, %v2355_v49 }
 0x18d   :  { %v2306_v53 = vpop.f32.mrb[35].mxu0  ;;  %v2359_v57 = vpop.f32.mrb[35].mxu1  ;;  %vm3245_vm0 = vcmp.gt.f32.partialorder %v3117_v51, 0.0  ;;  %v3373_v58 = vmul.f32 0.2, %v3117_v51  ;;  %v3149_v60 = vadd.f32 %v4215_v23, %v2304_v50  ;;  %vm3247_vm1 = vcmp.gt.f32.partialorder %v3119_v54, 0.0 }
 0x18e   :  { %v3375_v62 = vmul.f32 0.2, %v3119_v54  ;;  %vm3246_vm2 = vcmp.gt.f32.partialorder %v3118_v56, 0.0  ;;  %v3374_v29 = vmul.f32 0.2, %v3118_v56  ;;  %vm3248_vm3 = vcmp.gt.f32.partialorder %v3120_v59, 0.0 }
 0x18f   :  { %v3501_v63 = vsel %vm3245_vm0, %v3117_v51, %v3373_v58  ;;  %v3376_v1 = vmul.f32 0.2, %v3120_v59  ;;  %vm3277_vm4 = vcmp.gt.f32.partialorder %v3149_v60, 0.0  ;;  %v3405_v5 = vmul.f32 0.2, %v3149_v60 }
 0x190   :  { %3629 = vst [vmem:[#allocation5 + $0x80] sm:$0xff] %v3501_v63  ;;  %v3503_v2 = vsel %vm3247_vm1, %v3119_v54, %v3375_v62  ;;  %v3502_v3 = vsel %vm3246_vm2, %v3118_v56, %v3374_v29  ;;  %v3151_v6 = vadd.f32 %v4215_v23, %v2357_v52  ;;  %v3150_v9 = vadd.f32 %v4215_v23, %v2306_v53 }
 0x191   :  { %3631 = vst [vmem:[#allocation5 + $0x90] sm:$0xff] %v3503_v2  ;;  %3630 = vst [vmem:[#allocation5 + $0x88] sm:$0xff] %v3502_v3  ;;  %v3504_v8 = vsel %vm3248_vm3, %v3120_v59, %v3376_v1  ;;  %v3533_v13 = vsel %vm3277_vm4, %v3149_v60, %v3405_v5  ;;  %v3152_v17 = vadd.f32 %v4215_v23, %v2359_v57 }
 0x192   :  { %v2310_v7 = vpop.f32.mrb[36].mxu0  ;;  %v2363_v11 = vpop.f32.mrb[36].mxu1  ;;  %3632 = vst [vmem:[#allocation5 + $0x98] sm:$0xff] %v3504_v8  ;;  %vm3279_vm5 = vcmp.gt.f32.partialorder %v3151_v6, 0.0  ;;  %v3407_v14 = vmul.f32 0.2, %v3151_v6 }
 0x193   :  { %v2312_v12 = vpop.f32.mrb[37].mxu0  ;;  %v2365_v15 = vpop.f32.mrb[37].mxu1  ;;  %3661 = vst [vmem:[#allocation5 + $0x180] sm:$0xff] %v3533_v13  ;;  %vm3278_vm6 = vcmp.gt.f32.partialorder %v3150_v9, 0.0  ;;  %v3406_v37 = vmul.f32 0.2, %v3150_v9  ;;  %v3181_v18 = vadd.f32 %v4224_v41, %v2310_v7  ;;  %v3183_v21 = vadd.f32 %v4224_v41, %v2363_v11 }
 0x194   :  { %v2314_v16 = vpop.f32.mrb[38].mxu0  ;;  %v2367_v0 = vpop.f32.mrb[38].mxu1  ;;  %v3535_v20 = vsel %vm3279_vm5, %v3151_v6, %v3407_v14  ;;  %vm3280_vm7 = vcmp.gt.f32.partialorder %v3152_v17, 0.0  ;;  %v3408_v25 = vmul.f32 0.2, %v3152_v17  ;;  %v3182_v28 = vadd.f32 %v4224_v41, %v2312_v12 }
 0x195   :  { %v2316_v19 = vpop.f32.mrb[39].mxu0  ;;  %v2369_v22 = vpop.f32.mrb[39].mxu1  ;;  %3663 = vst [vmem:[#allocation5 + $0x190] sm:$0xff] %v3535_v20  ;;  %v3534_v24 = vsel %vm3278_vm6, %v3150_v9, %v3406_v37  ;;  %vm3309_vm8 = vcmp.gt.f32.partialorder %v3181_v18, 0.0  ;;  %v3437_v26 = vmul.f32 0.2, %v3181_v18  ;;  %v3184_v31 = vadd.f32 %v4224_v41, %v2365_v15 }
 0x196   :  { %3662 = vst [vmem:[#allocation5 + $0x188] sm:$0xff] %v3534_v24  ;;  %vm3311_vm9 = vcmp.gt.f32.partialorder %v3183_v21, 0.0  ;;  %v3439_v27 = vmul.f32 0.2, %v3183_v21  ;;  %v3536_v30 = vsel %vm3280_vm7, %v3152_v17, %v3408_v25  ;;  %vm3310_vm10 = vcmp.gt.f32.partialorder %v3182_v28, 0.0 }
 0x197   :  { %3664 = vst [vmem:[#allocation5 + $0x198] sm:$0xff] %v3536_v30  ;;  %v3565_v32 = vsel %vm3309_vm8, %v3181_v18, %v3437_v26  ;;  %v3438_v34 = vmul.f32 0.2, %v3182_v28  ;;  %vm3312_vm11 = vcmp.gt.f32.partialorder %v3184_v31, 0.0  ;;  %v3440_v35 = vmul.f32 0.2, %v3184_v31 }
 0x198   :  { %v3567_v33 = vsel %vm3311_vm9, %v3183_v21, %v3439_v27  ;;  %3693 = vst [vmem:[#allocation5 + $0x280] sm:$0xff] %v3565_v32  ;;  %v3213_v36 = vadd.f32 %v4231_v61, %v2314_v16  ;;  %v3215_v38 = vadd.f32 %v4231_v61, %v2367_v0  ;;  %v3214_v44 = vadd.f32 %v4231_v61, %v2316_v19 }
 0x199   :  { %3695 = vst [vmem:[#allocation5 + $0x290] sm:$0xff] %v3567_v33  ;;  %v3566_v39 = vsel %vm3310_vm10, %v3182_v28, %v3438_v34  ;;  %v3568_v40 = vsel %vm3312_vm11, %v3184_v31, %v3440_v35  ;;  %v3216_v55 = vadd.f32 %v4231_v61, %v2369_v22 }
 0x19a   :  { %3694 = vst [vmem:[#allocation5 + $0x288] sm:$0xff] %v3566_v39  ;;  %vm3341_vm12 = vcmp.gt.f32.partialorder %v3213_v36, 0.0  ;;  %v3469_v42 = vmul.f32 0.2, %v3213_v36  ;;  %vm3343_vm13 = vcmp.gt.f32.partialorder %v3215_v38, 0.0  ;;  %3696 = vst [vmem:[#allocation5 + $0x298] sm:$0xff] %v3568_v40 }
 0x19b   :  { %v3471_v43 = vmul.f32 0.2, %v3215_v38  ;;  %vm3342_vm14 = vcmp.gt.f32.partialorder %v3214_v44, 0.0  ;;  %v3470_v10 = vmul.f32 0.2, %v3214_v44  ;;  %vm3344_vm15 = vcmp.gt.f32.partialorder %v3216_v55, 0.0 }
 0x19c   :  { %v3597_v45 = vsel %vm3341_vm12, %v3213_v36, %v3469_v42  ;;  %v3472_v47 = vmul.f32 0.2, %v3216_v55 }
 0x19d   :  { %3725 = vst [vmem:[#allocation5 + $0x380] sm:$0xff] %v3597_v45  ;;  %v3599_v46 = vsel %vm3343_vm13, %v3215_v38, %v3471_v43  ;;  %v3598_v48 = vsel %vm3342_vm14, %v3214_v44, %v3470_v10 }
 0x19e   :  { %3727 = vst [vmem:[#allocation5 + $0x390] sm:$0xff] %v3599_v46  ;;  %3726 = vst [vmem:[#allocation5 + $0x388] sm:$0xff] %v3598_v48  ;;  %v3600_v49 = vsel %vm3344_vm15, %v3216_v55, %v3472_v47 }
 0x19f   :  { %3728 = vst [vmem:[#allocation5 + $0x398] sm:$0xff] %v3600_v49 }
 0x1aa   :  { %v2406_v50 = vpop.f32.mrb[40].mxu0  ;;  %v2459_v51 = vpop.f32.mrb[40].mxu1 }
 0x1ab   :  { %v2408_v52 = vpop.f32.mrb[41].mxu0  ;;  %v2461_v53 = vpop.f32.mrb[41].mxu1  ;;  %v3121_v56 = vadd.f32 %v4209_v4, %v2406_v50  ;;  %v3123_v59 = vadd.f32 %v4209_v4, %v2459_v51 }
 0x1ac   :  { %v2410_v54 = vpop.f32.mrb[42].mxu0  ;;  %v2463_v57 = vpop.f32.mrb[42].mxu1  ;;  %v3122_v60 = vadd.f32 %v4209_v4, %v2408_v52  ;;  %v3124_v63 = vadd.f32 %v4209_v4, %v2461_v53 }
 0x1ad   :  { %v2412_v58 = vpop.f32.mrb[43].mxu0  ;;  %v2465_v62 = vpop.f32.mrb[43].mxu1  ;;  %vm3249_vm0 = vcmp.gt.f32.partialorder %v3121_v56, 0.0  ;;  %v3377_v29 = vmul.f32 0.2, %v3121_v56  ;;  %v3153_v1 = vadd.f32 %v4215_v23, %v2410_v54  ;;  %vm3251_vm1 = vcmp.gt.f32.partialorder %v3123_v59, 0.0 }
 0x1ae   :  { %v3379_v2 = vmul.f32 0.2, %v3123_v59  ;;  %vm3250_vm2 = vcmp.gt.f32.partialorder %v3122_v60, 0.0  ;;  %v3378_v3 = vmul.f32 0.2, %v3122_v60  ;;  %vm3252_vm3 = vcmp.gt.f32.partialorder %v3124_v63, 0.0 }
 0x1af   :  { %v3505_v5 = vsel %vm3249_vm0, %v3121_v56, %v3377_v29  ;;  %v3380_v6 = vmul.f32 0.2, %v3124_v63  ;;  %vm3281_vm4 = vcmp.gt.f32.partialorder %v3153_v1, 0.0  ;;  %v3409_v9 = vmul.f32 0.2, %v3153_v1 }
 0x1b0   :  { %3633 = vst [vmem:[#allocation5 + $0xa0] sm:$0xff] %v3505_v5  ;;  %v3507_v7 = vsel %vm3251_vm1, %v3123_v59, %v3379_v2  ;;  %v3506_v8 = vsel %vm3250_vm2, %v3122_v60, %v3378_v3  ;;  %v3155_v11 = vadd.f32 %v4215_v23, %v2463_v57  ;;  %v3154_v14 = vadd.f32 %v4215_v23, %v2412_v58 }
 0x1b1   :  { %3635 = vst [vmem:[#allocation5 + $0xb0] sm:$0xff] %v3507_v7  ;;  %3634 = vst [vmem:[#allocation5 + $0xa8] sm:$0xff] %v3506_v8  ;;  %v3508_v13 = vsel %vm3252_vm3, %v3124_v63, %v3380_v6  ;;  %v3537_v37 = vsel %vm3281_vm4, %v3153_v1, %v3409_v9  ;;  %v3156_v20 = vadd.f32 %v4215_v23, %v2465_v62 }
 0x1b2   :  { %v2416_v12 = vpop.f32.mrb[44].mxu0  ;;  %v2469_v15 = vpop.f32.mrb[44].mxu1  ;;  %3636 = vst [vmem:[#allocation5 + $0xb8] sm:$0xff] %v3508_v13  ;;  %vm3283_vm5 = vcmp.gt.f32.partialorder %v3155_v11, 0.0  ;;  %v3411_v17 = vmul.f32 0.2, %v3155_v11 }
 0x1b3   :  { %v2418_v16 = vpop.f32.mrb[45].mxu0  ;;  %v2471_v18 = vpop.f32.mrb[45].mxu1  ;;  %3665 = vst [vmem:[#allocation5 + $0x1a0] sm:$0xff] %v3537_v37  ;;  %vm3282_vm6 = vcmp.gt.f32.partialorder %v3154_v14, 0.0  ;;  %v3410_v19 = vmul.f32 0.2, %v3154_v14  ;;  %v3185_v21 = vadd.f32 %v4224_v41, %v2416_v12  ;;  %v3187_v26 = vadd.f32 %v4224_v41, %v2469_v15 }
 0x1b4   :  { %v2420_v0 = vpop.f32.mrb[46].mxu0  ;;  %v2473_v22 = vpop.f32.mrb[46].mxu1  ;;  %v3539_v25 = vsel %vm3283_vm5, %v3155_v11, %v3411_v17  ;;  %vm3284_vm7 = vcmp.gt.f32.partialorder %v3156_v20, 0.0  ;;  %v3412_v30 = vmul.f32 0.2, %v3156_v20  ;;  %v3186_v33 = vadd.f32 %v4224_v41, %v2418_v16 }
 0x1b5   :  { %v2422_v24 = vpop.f32.mrb[47].mxu0  ;;  %v2475_v27 = vpop.f32.mrb[47].mxu1  ;;  %3667 = vst [vmem:[#allocation5 + $0x1b0] sm:$0xff] %v3539_v25  ;;  %v3538_v28 = vsel %vm3282_vm6, %v3154_v14, %v3410_v19  ;;  %vm3313_vm8 = vcmp.gt.f32.partialorder %v3185_v21, 0.0  ;;  %v3441_v31 = vmul.f32 0.2, %v3185_v21  ;;  %v3188_v35 = vadd.f32 %v4224_v41, %v2471_v18 }
 0x1b6   :  { %3666 = vst [vmem:[#allocation5 + $0x1a8] sm:$0xff] %v3538_v28  ;;  %vm3315_vm9 = vcmp.gt.f32.partialorder %v3187_v26, 0.0  ;;  %v3443_v32 = vmul.f32 0.2, %v3187_v26  ;;  %v3540_v34 = vsel %vm3284_vm7, %v3156_v20, %v3412_v30  ;;  %vm3314_vm10 = vcmp.gt.f32.partialorder %v3186_v33, 0.0 }
 0x1b7   :  { %3668 = vst [vmem:[#allocation5 + $0x1b8] sm:$0xff] %v3540_v34  ;;  %v3569_v36 = vsel %vm3313_vm8, %v3185_v21, %v3441_v31  ;;  %v3442_v39 = vmul.f32 0.2, %v3186_v33  ;;  %vm3316_vm11 = vcmp.gt.f32.partialorder %v3188_v35, 0.0  ;;  %v3444_v40 = vmul.f32 0.2, %v3188_v35 }
 0x1b8   :  { %v3571_v38 = vsel %vm3315_vm9, %v3187_v26, %v3443_v32  ;;  %3697 = vst [vmem:[#allocation5 + $0x2a0] sm:$0xff] %v3569_v36  ;;  %v3217_v42 = vadd.f32 %v4231_v61, %v2420_v0  ;;  %v3219_v43 = vadd.f32 %v4231_v61, %v2473_v22  ;;  %v3218_v10 = vadd.f32 %v4231_v61, %v2422_v24 }
 0x1b9   :  { %3699 = vst [vmem:[#allocation5 + $0x2b0] sm:$0xff] %v3571_v38  ;;  %v3570_v44 = vsel %vm3314_vm10, %v3186_v33, %v3442_v39  ;;  %v3572_v55 = vsel %vm3316_vm11, %v3188_v35, %v3444_v40  ;;  %v3220_v47 = vadd.f32 %v4231_v61, %v2475_v27 }
 0x1ba   :  { %3698 = vst [vmem:[#allocation5 + $0x2a8] sm:$0xff] %v3570_v44  ;;  %vm3345_vm12 = vcmp.gt.f32.partialorder %v3217_v42, 0.0  ;;  %v3473_v45 = vmul.f32 0.2, %v3217_v42  ;;  %vm3347_vm13 = vcmp.gt.f32.partialorder %v3219_v43, 0.0  ;;  %3700 = vst [vmem:[#allocation5 + $0x2b8] sm:$0xff] %v3572_v55 }
 0x1bb   :  { %v3475_v46 = vmul.f32 0.2, %v3219_v43  ;;  %vm3346_vm14 = vcmp.gt.f32.partialorder %v3218_v10, 0.0  ;;  %v3474_v50 = vmul.f32 0.2, %v3218_v10  ;;  %vm3348_vm15 = vcmp.gt.f32.partialorder %v3220_v47, 0.0 }
 0x1bc   :  { %v3601_v48 = vsel %vm3345_vm12, %v3217_v42, %v3473_v45  ;;  %v3476_v51 = vmul.f32 0.2, %v3220_v47 }
 0x1bd   :  { %3729 = vst [vmem:[#allocation5 + $0x3a0] sm:$0xff] %v3601_v48  ;;  %v3603_v49 = vsel %vm3347_vm13, %v3219_v43, %v3475_v46  ;;  %v3602_v52 = vsel %vm3346_vm14, %v3218_v10, %v3474_v50 }
 0x1be   :  { %3731 = vst [vmem:[#allocation5 + $0x3b0] sm:$0xff] %v3603_v49  ;;  %3730 = vst [vmem:[#allocation5 + $0x3a8] sm:$0xff] %v3602_v52  ;;  %v3604_v53 = vsel %vm3348_vm15, %v3220_v47, %v3476_v51 }
 0x1bf   :  { %3732 = vst [vmem:[#allocation5 + $0x3b8] sm:$0xff] %v3604_v53 }
 0x1ca   :  { %v2512_v54 = vpop.f32.mrb[48].mxu0  ;;  %v2565_v56 = vpop.f32.mrb[48].mxu1 }
 0x1cb   :  { %v2514_v57 = vpop.f32.mrb[49].mxu0  ;;  %v2567_v58 = vpop.f32.mrb[49].mxu1  ;;  %v3125_v60 = vadd.f32 %v4209_v4, %v2512_v54  ;;  %v3127_v63 = vadd.f32 %v4209_v4, %v2565_v56 }
 0x1cc   :  { %v2516_v59 = vpop.f32.mrb[50].mxu0  ;;  %v2569_v62 = vpop.f32.mrb[50].mxu1  ;;  %v3126_v1 = vadd.f32 %v4209_v4, %v2514_v57  ;;  %v3128_v5 = vadd.f32 %v4209_v4, %v2567_v58 }
 0x1cd   :  { %v2518_v29 = vpop.f32.mrb[51].mxu0  ;;  %v2571_v2 = vpop.f32.mrb[51].mxu1  ;;  %vm3253_vm0 = vcmp.gt.f32.partialorder %v3125_v60, 0.0  ;;  %v3381_v3 = vmul.f32 0.2, %v3125_v60  ;;  %v3157_v6 = vadd.f32 %v4215_v23, %v2516_v59  ;;  %vm3255_vm1 = vcmp.gt.f32.partialorder %v3127_v63, 0.0 }
 0x1ce   :  { %v3383_v7 = vmul.f32 0.2, %v3127_v63  ;;  %vm3254_vm2 = vcmp.gt.f32.partialorder %v3126_v1, 0.0  ;;  %v3382_v8 = vmul.f32 0.2, %v3126_v1  ;;  %vm3256_vm3 = vcmp.gt.f32.partialorder %v3128_v5, 0.0 }
 0x1cf   :  { %v3509_v9 = vsel %vm3253_vm0, %v3125_v60, %v3381_v3  ;;  %v3384_v11 = vmul.f32 0.2, %v3128_v5  ;;  %vm3285_vm4 = vcmp.gt.f32.partialorder %v3157_v6, 0.0  ;;  %v3413_v14 = vmul.f32 0.2, %v3157_v6 }
 0x1d0   :  { %3637 = vst [vmem:[#allocation5 + $0xc0] sm:$0xff] %v3509_v9  ;;  %v3511_v12 = vsel %vm3255_vm1, %v3127_v63, %v3383_v7  ;;  %v3510_v13 = vsel %vm3254_vm2, %v3126_v1, %v3382_v8  ;;  %v3159_v15 = vadd.f32 %v4215_v23, %v2569_v62  ;;  %v3158_v17 = vadd.f32 %v4215_v23, %v2518_v29 }
 0x1d1   :  { %3639 = vst [vmem:[#allocation5 + $0xd0] sm:$0xff] %v3511_v12  ;;  %3638 = vst [vmem:[#allocation5 + $0xc8] sm:$0xff] %v3510_v13  ;;  %v3512_v37 = vsel %vm3256_vm3, %v3128_v5, %v3384_v11  ;;  %v3541_v19 = vsel %vm3285_vm4, %v3157_v6, %v3413_v14  ;;  %v3160_v25 = vadd.f32 %v4215_v23, %v2571_v2 }
 0x1d2   :  { %v2522_v16 = vpop.f32.mrb[52].mxu0  ;;  %v2575_v18 = vpop.f32.mrb[52].mxu1  ;;  %3640 = vst [vmem:[#allocation5 + $0xd8] sm:$0xff] %v3512_v37  ;;  %vm3287_vm5 = vcmp.gt.f32.partialorder %v3159_v15, 0.0  ;;  %v3415_v20 = vmul.f32 0.2, %v3159_v15 }
 0x1d3   :  { %v2524_v0 = vpop.f32.mrb[53].mxu0  ;;  %v2577_v21 = vpop.f32.mrb[53].mxu1  ;;  %3669 = vst [vmem:[#allocation5 + $0x1c0] sm:$0xff] %v3541_v19  ;;  %vm3286_vm6 = vcmp.gt.f32.partialorder %v3158_v17, 0.0  ;;  %v3414_v24 = vmul.f32 0.2, %v3158_v17  ;;  %v3189_v26 = vadd.f32 %v4224_v41, %v2522_v16  ;;  %v3191_v31 = vadd.f32 %v4224_v41, %v2575_v18 }
 0x1d4   :  { %v2526_v22 = vpop.f32.mrb[54].mxu0  ;;  %v2579_v27 = vpop.f32.mrb[54].mxu1  ;;  %v3543_v30 = vsel %vm3287_vm5, %v3159_v15, %v3415_v20  ;;  %vm3288_vm7 = vcmp.gt.f32.partialorder %v3160_v25, 0.0  ;;  %v3416_v34 = vmul.f32 0.2, %v3160_v25  ;;  %v3190_v38 = vadd.f32 %v4224_v41, %v2524_v0 }
 0x1d5   :  { %v2528_v28 = vpop.f32.mrb[55].mxu0  ;;  %v2581_v32 = vpop.f32.mrb[55].mxu1  ;;  %3671 = vst [vmem:[#allocation5 + $0x1d0] sm:$0xff] %v3543_v30  ;;  %v3542_v33 = vsel %vm3286_vm6, %v3158_v17, %v3414_v24  ;;  %vm3317_vm8 = vcmp.gt.f32.partialorder %v3189_v26, 0.0  ;;  %v3445_v35 = vmul.f32 0.2, %v3189_v26  ;;  %v3192_v40 = vadd.f32 %v4224_v41, %v2577_v21 }
 0x1d6   :  { %3670 = vst [vmem:[#allocation5 + $0x1c8] sm:$0xff] %v3542_v33  ;;  %vm3319_vm9 = vcmp.gt.f32.partialorder %v3191_v31, 0.0  ;;  %v3447_v36 = vmul.f32 0.2, %v3191_v31  ;;  %v3544_v39 = vsel %vm3288_vm7, %v3160_v25, %v3416_v34  ;;  %vm3318_vm10 = vcmp.gt.f32.partialorder %v3190_v38, 0.0 }
 0x1d7   :  { %3672 = vst [vmem:[#allocation5 + $0x1d8] sm:$0xff] %v3544_v39  ;;  %v3573_v42 = vsel %vm3317_vm8, %v3189_v26, %v3445_v35  ;;  %v3446_v44 = vmul.f32 0.2, %v3190_v38  ;;  %vm3320_vm11 = vcmp.gt.f32.partialorder %v3192_v40, 0.0  ;;  %v3448_v55 = vmul.f32 0.2, %v3192_v40 }
 0x1d8   :  { %v3575_v43 = vsel %vm3319_vm9, %v3191_v31, %v3447_v36  ;;  %3701 = vst [vmem:[#allocation5 + $0x2c0] sm:$0xff] %v3573_v42  ;;  %v3221_v45 = vadd.f32 %v4231_v61, %v2526_v22  ;;  %v3223_v46 = vadd.f32 %v4231_v61, %v2579_v27  ;;  %v3222_v50 = vadd.f32 %v4231_v61, %v2528_v28 }
 0x1d9   :  { %3703 = vst [vmem:[#allocation5 + $0x2d0] sm:$0xff] %v3575_v43  ;;  %v3574_v10 = vsel %vm3318_vm10, %v3190_v38, %v3446_v44  ;;  %v3576_v47 = vsel %vm3320_vm11, %v3192_v40, %v3448_v55  ;;  %v3224_v51 = vadd.f32 %v4231_v61, %v2581_v32 }
 0x1da   :  { %3702 = vst [vmem:[#allocation5 + $0x2c8] sm:$0xff] %v3574_v10  ;;  %vm3349_vm12 = vcmp.gt.f32.partialorder %v3221_v45, 0.0  ;;  %v3477_v48 = vmul.f32 0.2, %v3221_v45  ;;  %vm3351_vm13 = vcmp.gt.f32.partialorder %v3223_v46, 0.0  ;;  %3704 = vst [vmem:[#allocation5 + $0x2d8] sm:$0xff] %v3576_v47 }
 0x1db   :  { %v3479_v49 = vmul.f32 0.2, %v3223_v46  ;;  %vm3350_vm14 = vcmp.gt.f32.partialorder %v3222_v50, 0.0  ;;  %v3478_v54 = vmul.f32 0.2, %v3222_v50  ;;  %vm3352_vm15 = vcmp.gt.f32.partialorder %v3224_v51, 0.0 }
 0x1dc   :  { %v3605_v52 = vsel %vm3349_vm12, %v3221_v45, %v3477_v48  ;;  %v3480_v56 = vmul.f32 0.2, %v3224_v51 }
 0x1dd   :  { %3733 = vst [vmem:[#allocation5 + $0x3c0] sm:$0xff] %v3605_v52  ;;  %v3607_v53 = vsel %vm3351_vm13, %v3223_v46, %v3479_v49  ;;  %v3606_v57 = vsel %vm3350_vm14, %v3222_v50, %v3478_v54 }
 0x1de   :  { %3735 = vst [vmem:[#allocation5 + $0x3d0] sm:$0xff] %v3607_v53  ;;  %3734 = vst [vmem:[#allocation5 + $0x3c8] sm:$0xff] %v3606_v57  ;;  %v3608_v58 = vsel %vm3352_vm15, %v3224_v51, %v3480_v56 }
 0x1df   :  { %3736 = vst [vmem:[#allocation5 + $0x3d8] sm:$0xff] %v3608_v58 }
 0x1ea   :  { %v2618_v59 = vpop.f32.mrb[56].mxu0  ;;  %v2671_v60 = vpop.f32.mrb[56].mxu1 }
 0x1eb   :  { %v2620_v62 = vpop.f32.mrb[57].mxu0  ;;  %v2673_v29 = vpop.f32.mrb[57].mxu1  ;;  %v3129_v1 = vadd.f32 %v4209_v4, %v2618_v59  ;;  %v3131_v5 = vadd.f32 %v4209_v4, %v2671_v60 }
 0x1ec   :  { %v2622_v63 = vpop.f32.mrb[58].mxu0  ;;  %v2675_v2 = vpop.f32.mrb[58].mxu1  ;;  %v3130_v6 = vadd.f32 %v4209_v4, %v2620_v62  ;;  %v3132_v9 = vadd.f32 %v4209_v4, %v2673_v29 }
 0x1ed   :  { %v2624_v3 = vpop.f32.mrb[59].mxu0  ;;  %v2677_v7 = vpop.f32.mrb[59].mxu1  ;;  %vm3257_vm0 = vcmp.gt.f32.partialorder %v3129_v1, 0.0  ;;  %v3385_v8 = vmul.f32 0.2, %v3129_v1  ;;  %v3161_v11 = vadd.f32 %v4215_v23, %v2622_v63  ;;  %vm3259_vm1 = vcmp.gt.f32.partialorder %v3131_v5, 0.0 }
 0x1ee   :  { %v3387_v12 = vmul.f32 0.2, %v3131_v5  ;;  %vm3258_vm2 = vcmp.gt.f32.partialorder %v3130_v6, 0.0  ;;  %v3386_v13 = vmul.f32 0.2, %v3130_v6  ;;  %vm3260_vm3 = vcmp.gt.f32.partialorder %v3132_v9, 0.0 }
 0x1ef   :  { %v3513_v14 = vsel %vm3257_vm0, %v3129_v1, %v3385_v8  ;;  %v3388_v15 = vmul.f32 0.2, %v3132_v9  ;;  %vm3289_vm4 = vcmp.gt.f32.partialorder %v3161_v11, 0.0  ;;  %v3417_v17 = vmul.f32 0.2, %v3161_v11 }
 0x1f0   :  { %3641 = vst [vmem:[#allocation5 + $0xe0] sm:$0xff] %v3513_v14  ;;  %v3515_v16 = vsel %vm3259_vm1, %v3131_v5, %v3387_v12  ;;  %v3514_v37 = vsel %vm3258_vm2, %v3130_v6, %v3386_v13  ;;  %v3163_v18 = vadd.f32 %v4215_v23, %v2675_v2  ;;  %v3162_v19 = vadd.f32 %v4215_v23, %v2624_v3 }
 0x1f1   :  { %3643 = vst [vmem:[#allocation5 + $0xf0] sm:$0xff] %v3515_v16  ;;  %3642 = vst [vmem:[#allocation5 + $0xe8] sm:$0xff] %v3514_v37  ;;  %v3516_v4 = vsel %vm3260_vm3, %v3132_v9, %v3388_v15  ;;  %v3545_v22 = vsel %vm3289_vm4, %v3161_v11, %v3417_v17  ;;  %v3164_v28 = vadd.f32 %v4215_v23, %v2677_v7 }
 0x1f2   :  { %v2628_v0 = vpop.f32.mrb[60].mxu0  ;;  %v2681_v20 = vpop.f32.mrb[60].mxu1  ;;  %3644 = vst [vmem:[#allocation5 + $0xf8] sm:$0xff] %v3516_v4  ;;  %vm3291_vm5 = vcmp.gt.f32.partialorder %v3163_v18, 0.0  ;;  %v3419_v24 = vmul.f32 0.2, %v3163_v18 }
 0x1f3   :  { %v2630_v21 = vpop.f32.mrb[61].mxu0  ;;  %v2683_v25 = vpop.f32.mrb[61].mxu1  ;;  %3673 = vst [vmem:[#allocation5 + $0x1e0] sm:$0xff] %v3545_v22  ;;  %vm3290_vm6 = vcmp.gt.f32.partialorder %v3162_v19, 0.0  ;;  %v3418_v27 = vmul.f32 0.2, %v3162_v19  ;;  %v3193_v30 = vadd.f32 %v4224_v41, %v2628_v0  ;;  %v3195_v34 = vadd.f32 %v4224_v41, %v2681_v20 }
 0x1f4   :  { %v2632_v26 = vpop.f32.mrb[62].mxu0  ;;  %v2685_v31 = vpop.f32.mrb[62].mxu1  ;;  %v3547_v33 = vsel %vm3291_vm5, %v3163_v18, %v3419_v24  ;;  %vm3292_vm7 = vcmp.gt.f32.partialorder %v3164_v28, 0.0  ;;  %v3420_v38 = vmul.f32 0.2, %v3164_v28  ;;  %v3194_v42 = vadd.f32 %v4224_v41, %v2630_v21 }
 0x1f5   :  { %v2634_v32 = vpop.f32.mrb[63].mxu0  ;;  %v2687_v35 = vpop.f32.mrb[63].mxu1  ;;  %3675 = vst [vmem:[#allocation5 + $0x1f0] sm:$0xff] %v3547_v33  ;;  %v3546_v36 = vsel %vm3290_vm6, %v3162_v19, %v3418_v27  ;;  %vm3321_vm8 = vcmp.gt.f32.partialorder %v3193_v30, 0.0  ;;  %v3449_v39 = vmul.f32 0.2, %v3193_v30  ;;  %v3196_v43 = vadd.f32 %v4224_v41, %v2683_v25 }
 0x1f6   :  { %3674 = vst [vmem:[#allocation5 + $0x1e8] sm:$0xff] %v3546_v36  ;;  %vm3323_vm9 = vcmp.gt.f32.partialorder %v3195_v34, 0.0  ;;  %v3451_v40 = vmul.f32 0.2, %v3195_v34  ;;  %v3548_v23 = vsel %vm3292_vm7, %v3164_v28, %v3420_v38  ;;  %vm3322_vm10 = vcmp.gt.f32.partialorder %v3194_v42, 0.0 }
 0x1f7   :  { %3676 = vst [vmem:[#allocation5 + $0x1f8] sm:$0xff] %v3548_v23  ;;  %v3577_v44 = vsel %vm3321_vm8, %v3193_v30, %v3449_v39  ;;  %v3450_v45 = vmul.f32 0.2, %v3194_v42  ;;  %vm3324_vm11 = vcmp.gt.f32.partialorder %v3196_v43, 0.0  ;;  %v3452_v46 = vmul.f32 0.2, %v3196_v43 }
 0x1f8   :  { %v3579_v55 = vsel %vm3323_vm9, %v3195_v34, %v3451_v40  ;;  %3705 = vst [vmem:[#allocation5 + $0x2e0] sm:$0xff] %v3577_v44  ;;  %v3225_v10 = vadd.f32 %v4231_v61, %v2632_v26  ;;  %v3227_v47 = vadd.f32 %v4231_v61, %v2685_v31  ;;  %v3226_v51 = vadd.f32 %v4231_v61, %v2634_v32 }
 0x1f9   :  { %3707 = vst [vmem:[#allocation5 + $0x2f0] sm:$0xff] %v3579_v55  ;;  %v3578_v48 = vsel %vm3322_vm10, %v3194_v42, %v3450_v45  ;;  %v3580_v49 = vsel %vm3324_vm11, %v3196_v43, %v3452_v46  ;;  %v3228_v52 = vadd.f32 %v4231_v61, %v2687_v35 }
 0x1fa   :  { %3706 = vst [vmem:[#allocation5 + $0x2e8] sm:$0xff] %v3578_v48  ;;  %vm3353_vm12 = vcmp.gt.f32.partialorder %v3225_v10, 0.0  ;;  %v3481_v50 = vmul.f32 0.2, %v3225_v10  ;;  %vm3355_vm13 = vcmp.gt.f32.partialorder %v3227_v47, 0.0  ;;  %3708 = vst [vmem:[#allocation5 + $0x2f8] sm:$0xff] %v3580_v49 }
 0x1fb   :  { %v3483_v41 = vmul.f32 0.2, %v3227_v47  ;;  %vm3354_vm14 = vcmp.gt.f32.partialorder %v3226_v51, 0.0  ;;  %v3482_v56 = vmul.f32 0.2, %v3226_v51  ;;  %vm3356_vm15 = vcmp.gt.f32.partialorder %v3228_v52, 0.0 }
 0x1fc   :  { %v3609_v53 = vsel %vm3353_vm12, %v3225_v10, %v3481_v50  ;;  %v3484_v57 = vmul.f32 0.2, %v3228_v52 }
 0x1fd   :  { %3737 = vst [vmem:[#allocation5 + $0x3e0] sm:$0xff] %v3609_v53  ;;  %v3611_v54 = vsel %vm3355_vm13, %v3227_v47, %v3483_v41  ;;  %v3610_v58 = vsel %vm3354_vm14, %v3226_v51, %v3482_v56 }
 0x1fe   :  { %3739 = vst [vmem:[#allocation5 + $0x3f0] sm:$0xff] %v3611_v54  ;;  %3738 = vst [vmem:[#allocation5 + $0x3e8] sm:$0xff] %v3610_v58  ;;  %v3612_v59 = vsel %vm3356_vm15, %v3228_v52, %v3484_v57 }
 0x1ff   :  { %3740 = vst [vmem:[#allocation5 + $0x3f8] sm:$0xff] %v3612_v59 }
 0x200   :  { %4063 = shalt.err (!%p4060_p12)
}
 0x201   :  { %s4064_s17 = scalar_lea.hbm %s4374_s3, 16384 }
 0x202   :  { %p4065_p13 = scmp.ne.s32.totalorder %s4374_s3, %s4064_s17  ;;  %p4068_p0 = scmp.lt.u32.totalorder %s4064_s17, %s4374_s3 }
 0x204   :  { %p4070_p1 = pnand %p4068_p0, %p4065_p13 }
 0x206   :  { %4073 = shalt.err (!%p4070_p1)
}
 0x207   :  { %s4083_s22 = smov 4096   ;;  %s4084_s23 = smov 256  }
 0x208   :  { %3752 = dma.vmem_to_hbm [thread:$0]  %s3747_s13, 16384, %s4374_s3, [#allocation4], %s4083_s22, %s4083_s22, %s4084_s23  }
 0x209   :  { %4076 = dma.done.wait [#allocation4], 16384  }
 0x20a   :  { %4077 = vsyncadd [#allocation4], 4294950912 }
 0x20b   :  { %3756 = vsyncpa [#allocation3], 1 }
 0x20c   :  { %3757 = vsyncpa [#allocation4], 1 }

</bundles_post_ra>
